<compile_context>
chip_gen: v6e
topology: v6e:2x2x1
jax: 0.10.0
libtpu: 0.0.40
codegen_flags: <defaults>
</compile_context>

<pallas_src>
import functools

import jax
import jax.numpy as jnp
import numpy as np
from jax.experimental import pallas as pl
from jax.experimental.pallas import tpu as pltpu  # noqa: F401  (kept for TPU-specific extensions)

# ---------------- tiny config (consistent with the module's forward) ----------------
IMG_C, IMG_H, IMG_W = 4, 16, 16                      # config.input_size = (4, 16, 16)
PATCH = 8                                            # config.patch['size']
NUM_PATCHES = (IMG_H // PATCH) * (IMG_W // PATCH)    # 4
SEQ = NUM_PATCHES + 1                                # cls token + patches = 5
HIDDEN = 32                                          # config.hidden_size
HEADS = 4                                            # config.transformer.head_num
HEAD_DIM = HIDDEN // HEADS                           # 8
MLP_DIM = 64                                         # config.transformer.mlp_dim
LAYERS = 2                                           # config.transformer.layer_num
NUM_CLASSES = 8                                      # config.num_classes
CPP = IMG_C * PATCH * PATCH                          # 256 (im2col patch vector)
EPS = 1e-6
NEG_INF = -1e9


# ---------------- fused Pallas kernel ----------------
def _layernorm(v, g, b):
    mu = jnp.mean(v, axis=-1, keepdims=True)
    var = jnp.mean((v - mu) ** 2, axis=-1, keepdims=True)
    return (v - mu) * jax.lax.rsqrt(var + EPS) * g + b


def vit_fused_kernel(
    batch,                                           # static (bound via partial)
    patches_ref, base_ref, conv_w_ref,
    ln1g_ref, ln1b_ref, wqkv_ref, bqkv_ref, wo_ref, bo_ref,
    ln2g_ref, ln2b_ref, w1_ref, b1_ref, w2_ref, b2_ref,
    encg_ref, encb_ref, headw_ref, headb_ref,
    o_ref,
):
    f32 = jnp.float32
    bs = batch * SEQ

    # ---- token assembly in ONE matmul + add (token-major layout) ----
    # patches_ref rows 0..B-1 are zeros (cls slots); base carries cls + pos + conv bias.
    x = (
        jnp.dot(patches_ref[...], conv_w_ref[...], preferred_element_type=f32)
        + base_ref[...]
    )                                                # (B*S, D), vreg-resident value
    # dropout = identity at inference

    # ---- in-kernel cross-batch block-diagonal mask (batch id = row % B) ----
    rows = jax.lax.broadcasted_iota(jnp.int32, (bs, bs), 0)
    cols = jax.lax.broadcasted_iota(jnp.int32, (bs, bs), 1)
    mask = jnp.where((rows % batch) == (cols % batch), f32(0.0), f32(NEG_INF))

    scale = f32(HEAD_DIM ** -0.5)

    # ---- transformer encoder layers (stacked weights, static layer loop) ----
    for l in range(LAYERS):
        # --- attention branch (pre-LN) ---
        h = _layernorm(x, ln1g_ref[l], ln1b_ref[l])
        qkv = jnp.dot(h, wqkv_ref[l], preferred_element_type=f32) + bqkv_ref[l]  # (B*S, 3D)
        wo_l = wo_ref[l]

        attn = None
        for hh in range(HEADS):                      # static unroll; batch folded into rows
            q_h = qkv[:, hh * HEAD_DIM:(hh + 1) * HEAD_DIM]
            k_h = qkv[:, HIDDEN + hh * HEAD_DIM: HIDDEN + (hh + 1) * HEAD_DIM]
            v_h = qkv[:, 2 * HIDDEN + hh * HEAD_DIM: 2 * HIDDEN + (hh + 1) * HEAD_DIM]
            # scores over all rows; cross-batch entries masked to -1e9
            s = jax.lax.dot_general(
                q_h, k_h, (((1,), (1,)), ((), ())), preferred_element_type=f32
            ) * scale + mask                          # (B*S, B*S)
            s = s - jnp.max(s, axis=-1, keepdims=True)
            p = jnp.exp(s)
            inv = pl.reciprocal(jnp.sum(p, axis=-1, keepdims=True), approx=True)
            p = p * inv
            o_h = jnp.dot(p, v_h, preferred_element_type=f32)                    # (B*S, dh)
            # fold head-concat into the output projection (no jnp.concatenate)
            contrib = jnp.dot(
                o_h, wo_l[hh * HEAD_DIM:(hh + 1) * HEAD_DIM, :],
                preferred_element_type=f32,
            )
            attn = contrib if attn is None else attn + contrib
        x = x + attn + bo_ref[l]                      # residual 1 (+ out-proj bias)

        # --- MLP branch (pre-LN) ---
        h2 = _layernorm(x, ln2g_ref[l], ln2b_ref[l])
        m = jnp.dot(h2, w1_ref[l], preferred_element_type=f32) + b1_ref[l]
        m = 0.5 * m * (1.0 + jax.lax.erf(m * f32(0.7071067811865476)))           # exact GELU
        x = x + jnp.dot(m, w2_ref[l], preferred_element_type=f32) + b2_ref[l]    # residual 2

    # ---- epilogue: slice the B cls rows FIRST, then LN + head, one bulk store ----
    cls_x = x[0:batch, :]                             # rows 0..B-1 are cls tokens
    xn = _layernorm(cls_x, encg_ref[...], encb_ref[...])
    o_ref[...] = (
        jnp.dot(xn, headw_ref[...], preferred_element_type=f32) + headb_ref[...]
    )


# ---------------- wrappers ----------------
def extract_patches(img):
    """NCHW -> (B, N, C*P*P); patch order row-major (h, w) matching Conv2d flatten(2)."""
    B = img.shape[0]
    x = img.reshape(B, IMG_C, IMG_H // PATCH, PATCH, IMG_W // PATCH, PATCH)
    x = x.transpose(0, 2, 4, 1, 3, 5)                 # (B, gh, gw, C, P, P)
    return x.reshape(B, NUM_PATCHES, CPP)


def _stack(blocks, key):
    return jnp.stack([blk[key] for blk in blocks], axis=0)


def prepare_weights(params):
    """One-time weight restaging (hoisted out of the per-call path)."""
    blocks = params["blocks"]
    wqkv = jnp.stack(
        [jnp.concatenate([blk["wq"], blk["wk"], blk["wv"]], axis=1) for blk in blocks], 0)
    bqkv = jnp.stack(
        [jnp.concatenate([blk["bq"], blk["bk"], blk["bv"]], axis=1) for blk in blocks], 0)
    return dict(
        conv_w=params["conv_w"], conv_b=params["conv_b"],
        cls=params["cls"].reshape(1, HIDDEN), pos=params["pos"].reshape(SEQ, HIDDEN),
        ln1g=_stack(blocks, "ln1_g"), ln1b=_stack(blocks, "ln1_b"),
        wqkv=wqkv, bqkv=bqkv,
        wo=_stack(blocks, "wo"), bo=_stack(blocks, "bo"),
        ln2g=_stack(blocks, "ln2_g"), ln2b=_stack(blocks, "ln2_b"),
        w1=_stack(blocks, "w1"), b1=_stack(blocks, "b1"),
        w2=_stack(blocks, "w2"), b2=_stack(blocks, "b2"),
        encg=params["enc_g"], encb=params["enc_b"],
        headw=params["head_w"], headb=params["head_b"],
    )


@jax.jit
def _vit_forward_impl(img, fw):
    B = img.shape[0]
    bs = B * SEQ

    # token-major patch rows: row = n*B + b; prepend B zero rows for cls slots
    pat = extract_patches(img)                                        # (B, N, CPP)
    pat_tm = pat.transpose(1, 0, 2).reshape(B * NUM_PATCHES, CPP)     # (N*B, CPP)
    patches_padded = jnp.concatenate(
        [jnp.zeros((B, CPP), jnp.float32), pat_tm], axis=0)           # (B*S, CPP)

    # base table: pos per row (+ cls for cls rows, + conv bias for patch rows)
    pos_rows = jnp.broadcast_to(
        fw["pos"][:, None, :], (SEQ, B, HIDDEN)).reshape(bs, HIDDEN)
    add_rows = jnp.concatenate(
        [jnp.broadcast_to(fw["cls"], (B, HIDDEN)),
         jnp.broadcast_to(fw["conv_b"], (B * NUM_PATCHES, HIDDEN))], axis=0)
    base = pos_rows + add_rows                                        # (B*S, D)

    kernel = functools.partial(vit_fused_kernel, B)
    logits = pl.pallas_call(
        kernel,
        out_shape=jax.ShapeDtypeStruct((B, NUM_CLASSES), jnp.float32),
    )(
        patches_padded, base, fw["conv_w"],
        fw["ln1g"], fw["ln1b"], fw["wqkv"], fw["bqkv"], fw["wo"], fw["bo"],
        fw["ln2g"], fw["ln2b"], fw["w1"], fw["b1"], fw["w2"], fw["b2"],
        fw["encg"], fw["encb"], fw["headw"], fw["headb"],
    )
    return logits


def vit_forward(img, fw):
    return _vit_forward_impl(img, fw), []    # vis=False -> no attention weights collected


# ---------------- deterministic parameter init ----------------
def init_params(key):
    keys = jax.random.split(key, 5 + LAYERS)

    def dense(k, din, dout, w_scale=0.02, b_scale=0.01):
        kw, kb = jax.random.split(k)
        w = jax.random.normal(kw, (din, dout), jnp.float32) * w_scale
        b = jax.random.normal(kb, (1, dout), jnp.float32) * b_scale
        return w, b

    params = {}
    conv_w = jax.random.normal(keys[0], (HIDDEN, IMG_C, PATCH, PATCH), jnp.float32) * 0.02
    params["conv_w"] = conv_w.reshape(HIDDEN, -1).T        # (C*P*P, HIDDEN)
    params["conv_b"] = jax.random.normal(keys[1], (1, HIDDEN), jnp.float32) * 0.01
    params["cls"] = jax.random.normal(keys[2], (1, 1, HIDDEN), jnp.float32) * 0.02
    params["pos"] = jax.random.normal(keys[3], (1, SEQ, HIDDEN), jnp.float32) * 0.02

    blocks = []
    for l in range(LAYERS):
        bk = jax.random.split(keys[4 + l], 6)
        wq, bq = dense(bk[0], HIDDEN, HIDDEN)
        wk, bkb = dense(bk[1], HIDDEN, HIDDEN)
        wv, bv = dense(bk[2], HIDDEN, HIDDEN)
        wo, bo = dense(bk[3], HIDDEN, HIDDEN)
        w1, b1 = dense(bk[4], HIDDEN, MLP_DIM)
        w2, b2 = dense(bk[5], MLP_DIM, HIDDEN)
        blocks.append(dict(
            ln1_g=jnp.ones((1, HIDDEN), jnp.float32), ln1_b=jnp.zeros((1, HIDDEN), jnp.float32),
            wq=wq, bq=bq, wk=wk, bk=bkb, wv=wv, bv=bv, wo=wo, bo=bo,
            ln2_g=jnp.ones((1, HIDDEN), jnp.float32), ln2_b=jnp.zeros((1, HIDDEN), jnp.float32),
            w1=w1, b1=b1, w2=w2, b2=b2,
        ))
    params["blocks"] = blocks
    params["enc_g"] = jnp.ones((1, HIDDEN), jnp.float32)
    params["enc_b"] = jnp.zeros((1, HIDDEN), jnp.float32)
    hw, hb = dense(keys[4 + LAYERS], HIDDEN, NUM_CLASSES)
    params["head_w"], params["head_b"] = hw, hb
    return params


# ---------------- pure-JAX reference (for correctness check) ----------------
def _ln_ref(x, g, b):
    mu = x.mean(-1, keepdims=True)
    var = ((x - mu) ** 2).mean(-1, keepdims=True)
    return (x - mu) / jnp.sqrt(var + EPS) * g + b


def vit_ref(img, params):
    B = img.shape[0]
    patches = extract_patches(img).reshape(B * NUM_PATCHES, -1)
    feats = (patches @ params["conv_w"] + params["conv_b"]).reshape(B, NUM_PATCHES, HIDDEN)
    x = jnp.concatenate([jnp.broadcast_to(params["cls"], (B, 1, HIDDEN)), feats], 1) + params["pos"]
    for p in params["blocks"]:
        h = _ln_ref(x, p["ln1_g"][0], p["ln1_b"][0])
        q = h @ p["wq"] + p["bq"]
        k = h @ p["wk"] + p["bk"]
        v = h @ p["wv"] + p["bv"]
        qh = q.reshape(B, SEQ, HEADS, HEAD_DIM).transpose(0, 2, 1, 3)
        kh = k.reshape(B, SEQ, HEADS, HEAD_DIM).transpose(0, 2, 1, 3)
        vh = v.reshape(B, SEQ, HEADS, HEAD_DIM).transpose(0, 2, 1, 3)
        sc = jnp.einsum("bhqd,bhkd->bhqk", qh, kh) * HEAD_DIM ** (-0.5)
        w = jax.nn.softmax(sc, axis=-1)
        o = jnp.einsum("bhqk,bhkd->bhqd", w, vh).transpose(0, 2, 1, 3).reshape(B, SEQ, HIDDEN)
        x = x + (o @ p["wo"] + p["bo"])
        h2 = _ln_ref(x, p["ln2_g"][0], p["ln2_b"][0])
        m = h2 @ p["w1"] + p["b1"]
        m = 0.5 * m * (1.0 + jax.lax.erf(m / jnp.sqrt(2.0)))
        x = x + (m @ p["w2"] + p["b2"])
    cls_tok = _ln_ref(x[:, 0], params["enc_g"][0], params["enc_b"][0])
    return cls_tok @ params["head_w"] + params["head_b"]


if __name__ == "__main__":
    key = jax.random.PRNGKey(0)
    kimg, kparam = jax.random.split(key)
    img = jax.random.normal(kimg, (2, IMG_C, IMG_H, IMG_W), jnp.float32)  # NCHW
    params = init_params(kparam)
    fw = prepare_weights(params)          # one-time weight restaging, outside the call path

    logits, attn_weights = vit_forward(img, fw)
    jax.block_until_ready(logits)
    assert logits.shape == (2, NUM_CLASSES)

    ref = vit_ref(img, params)
    np.testing.assert_allclose(np.asarray(logits), np.asarray(ref), rtol=2e-2, atol=2e-2)
    print("KERNEL_OK")
</pallas_src>

<mosaic_0001>
module attributes {stable_mosaic.version = 11 : i64} {
  func.func @vit_fused_kernel(%arg0: memref<10x256xf32, #tpu.memory_space<vmem>>, %arg1: memref<10x32xf32, #tpu.memory_space<vmem>>, %arg2: memref<256x32xf32, #tpu.memory_space<vmem>>, %arg3: memref<2x1x32xf32, #tpu.memory_space<vmem>>, %arg4: memref<2x1x32xf32, #tpu.memory_space<vmem>>, %arg5: memref<2x32x96xf32, #tpu.memory_space<vmem>>, %arg6: memref<2x1x96xf32, #tpu.memory_space<vmem>>, %arg7: memref<2x32x32xf32, #tpu.memory_space<vmem>>, %arg8: memref<2x1x32xf32, #tpu.memory_space<vmem>>, %arg9: memref<2x1x32xf32, #tpu.memory_space<vmem>>, %arg10: memref<2x1x32xf32, #tpu.memory_space<vmem>>, %arg11: memref<2x32x64xf32, #tpu.memory_space<vmem>>, %arg12: memref<2x1x64xf32, #tpu.memory_space<vmem>>, %arg13: memref<2x64x32xf32, #tpu.memory_space<vmem>>, %arg14: memref<2x1x32xf32, #tpu.memory_space<vmem>>, %arg15: memref<1x32xf32, #tpu.memory_space<vmem>>, %arg16: memref<1x32xf32, #tpu.memory_space<vmem>>, %arg17: memref<32x8xf32, #tpu.memory_space<vmem>>, %arg18: memref<1x8xf32, #tpu.memory_space<vmem>>, %arg19: memref<2x8xf32, #tpu.memory_space<vmem>>) attributes {dimension_semantics = [], scalar_prefetch = 0 : i64, scratch_operands = 0 : i64, tpu.core_type = #tpu.core_type<tc>} {
    %c0 = arith.constant 0 : index
    %c0_0 = arith.constant 0 : index
    %0 = vector.load %arg0[%c0, %c0_0] : memref<10x256xf32, #tpu.memory_space<vmem>>, vector<10x256xf32>
    %c0_1 = arith.constant 0 : index
    %c0_2 = arith.constant 0 : index
    %1 = vector.load %arg2[%c0_1, %c0_2] : memref<256x32xf32, #tpu.memory_space<vmem>>, vector<256x32xf32>
    %cst = arith.constant dense<0.000000e+00> : vector<10x32xf32>
    %2 = tpu.matmul %0, %1, %cst {dimension_numbers = #tpu.dot_dimension_numbers<[1], [0], [0], [1], [0, 0, 1, 1], [], []>} : vector<10x256xf32>, vector<256x32xf32>, vector<10x32xf32> -> vector<10x32xf32>
    %c0_3 = arith.constant 0 : index
    %c0_4 = arith.constant 0 : index
    %3 = vector.load %arg1[%c0_3, %c0_4] : memref<10x32xf32, #tpu.memory_space<vmem>>, vector<10x32xf32>
    %4 = arith.addf %2, %3 : vector<10x32xf32>
    %5 = tpu.iota {dimensions = array<i32: 0>} : vector<10x10xi32>
    %6 = tpu.iota {dimensions = array<i32: 1>} : vector<10x10xi32>
    %c2_i32 = arith.constant 2 : i32
    %c0_i32 = arith.constant 0 : i32
    %7 = arith.cmpi eq, %c2_i32, %c0_i32 : i32
    %c1_i32 = arith.constant 1 : i32
    %8 = arith.select %7, %c1_i32, %c2_i32 : i32
    %9 = vector.broadcast %8 : i32 to vector<10x10xi32>
    %10 = arith.remsi %5, %9 : vector<10x10xi32>
    %c0_i32_5 = arith.constant 0 : i32
    %11 = vector.broadcast %c0_i32_5 : i32 to vector<10x10xi32>
    %12 = arith.cmpi ne, %10, %11 : vector<10x10xi32>
    %c0_i32_6 = arith.constant 0 : i32
    %13 = vector.broadcast %c0_i32_6 : i32 to vector<10x10xi32>
    %14 = arith.cmpi slt, %10, %13 : vector<10x10xi32>
    %c0_i32_7 = arith.constant 0 : i32
    %15 = arith.cmpi slt, %8, %c0_i32_7 : i32
    %16 = vector.broadcast %15 : i1 to vector<10x10xi1>
    %17 = vector.broadcast %16 : vector<10x10xi1> to vector<10x10xi1>
    %18 = arith.xori %14, %17 : vector<10x10xi1>
    %19 = arith.andi %18, %12 : vector<10x10xi1>
    %20 = vector.broadcast %8 : i32 to vector<10x10xi32>
    %21 = arith.addi %10, %20 : vector<10x10xi32>
    %22 = arith.select %19, %21, %10 : vector<10x10xi1>, vector<10x10xi32>
    %c2_i32_8 = arith.constant 2 : i32
    %c0_i32_9 = arith.constant 0 : i32
    %23 = arith.cmpi eq, %c2_i32_8, %c0_i32_9 : i32
    %c1_i32_10 = arith.constant 1 : i32
    %24 = arith.select %23, %c1_i32_10, %c2_i32_8 : i32
    %25 = vector.broadcast %24 : i32 to vector<10x10xi32>
    %26 = arith.remsi %6, %25 : vector<10x10xi32>
    %c0_i32_11 = arith.constant 0 : i32
    %27 = vector.broadcast %c0_i32_11 : i32 to vector<10x10xi32>
    %28 = arith.cmpi ne, %26, %27 : vector<10x10xi32>
    %c0_i32_12 = arith.constant 0 : i32
    %29 = vector.broadcast %c0_i32_12 : i32 to vector<10x10xi32>
    %30 = arith.cmpi slt, %26, %29 : vector<10x10xi32>
    %c0_i32_13 = arith.constant 0 : i32
    %31 = arith.cmpi slt, %24, %c0_i32_13 : i32
    %32 = vector.broadcast %31 : i1 to vector<10x10xi1>
    %33 = vector.broadcast %32 : vector<10x10xi1> to vector<10x10xi1>
    %34 = arith.xori %30, %33 : vector<10x10xi1>
    %35 = arith.andi %34, %28 : vector<10x10xi1>
    %36 = vector.broadcast %24 : i32 to vector<10x10xi32>
    %37 = arith.addi %26, %36 : vector<10x10xi32>
    %38 = arith.select %35, %37, %26 : vector<10x10xi1>, vector<10x10xi32>
    %39 = arith.cmpi eq, %22, %38 : vector<10x10xi32>
    %cst_14 = arith.constant 0.000000e+00 : f32
    %cst_15 = arith.constant -1.000000e+09 : f32
    %40 = vector.broadcast %cst_14 : f32 to vector<10x10xf32>
    %41 = vector.broadcast %cst_15 : f32 to vector<10x10xf32>
    %42 = arith.select %39, %40, %41 : vector<10x10xi1>, vector<10x10xf32>
    %c0_16 = arith.constant 0 : index
    %c0_17 = arith.constant 0 : index
    %c0_18 = arith.constant 0 : index
    %43 = vector.load %arg3[%c0_16, %c0_17, %c0_18] : memref<2x1x32xf32, #tpu.memory_space<vmem>>, vector<1x1x32xf32>
    %44 = vector.shape_cast %43 : vector<1x1x32xf32> to vector<1x32xf32>
    %c0_19 = arith.constant 0 : index
    %c0_20 = arith.constant 0 : index
    %c0_21 = arith.constant 0 : index
    %45 = vector.load %arg4[%c0_19, %c0_20, %c0_21] : memref<2x1x32xf32, #tpu.memory_space<vmem>>, vector<1x1x32xf32>
    %46 = vector.shape_cast %45 : vector<1x1x32xf32> to vector<1x32xf32>
    %cst_22 = arith.constant dense<0.000000e+00> : vector<10xf32>
    %47 = vector.multi_reduction <add>, %4, %cst_22 [1] : vector<10x32xf32> to vector<10xf32>
    %48 = vector.shape_cast %47 : vector<10xf32> to vector<10x1xf32>
    %cst_23 = arith.constant 3.200000e+01 : f32
    %49 = vector.broadcast %cst_23 : f32 to vector<10x1xf32>
    %50 = arith.divf %48, %49 : vector<10x1xf32>
    %51 = vector.broadcast %50 : vector<10x1xf32> to vector<10x32xf32>
    %52 = arith.subf %4, %51 : vector<10x32xf32>
    %53 = arith.mulf %52, %52 : vector<10x32xf32>
    %cst_24 = arith.constant dense<0.000000e+00> : vector<10xf32>
    %54 = vector.multi_reduction <add>, %53, %cst_24 [1] : vector<10x32xf32> to vector<10xf32>
    %55 = vector.shape_cast %54 : vector<10xf32> to vector<10x1xf32>
    %cst_25 = arith.constant 3.200000e+01 : f32
    %56 = vector.broadcast %cst_25 : f32 to vector<10x1xf32>
    %57 = arith.divf %55, %56 : vector<10x1xf32>
    %58 = vector.broadcast %50 : vector<10x1xf32> to vector<10x32xf32>
    %59 = arith.subf %4, %58 : vector<10x32xf32>
    %cst_26 = arith.constant 9.99999997E-7 : f32
    %60 = vector.broadcast %cst_26 : f32 to vector<10x1xf32>
    %61 = arith.addf %57, %60 : vector<10x1xf32>
    %62 = math.rsqrt %61 : vector<10x1xf32>
    %63 = vector.broadcast %62 : vector<10x1xf32> to vector<10x32xf32>
    %64 = arith.mulf %59, %63 : vector<10x32xf32>
    %65 = vector.broadcast %44 : vector<1x32xf32> to vector<10x32xf32>
    %66 = arith.mulf %64, %65 : vector<10x32xf32>
    %67 = vector.broadcast %46 : vector<1x32xf32> to vector<10x32xf32>
    %68 = arith.addf %66, %67 : vector<10x32xf32>
    %c0_27 = arith.constant 0 : index
    %c0_28 = arith.constant 0 : index
    %c0_29 = arith.constant 0 : index
    %69 = vector.load %arg5[%c0_27, %c0_28, %c0_29] : memref<2x32x96xf32, #tpu.memory_space<vmem>>, vector<1x32x96xf32>
    %70 = vector.shape_cast %69 : vector<1x32x96xf32> to vector<32x96xf32>
    %cst_30 = arith.constant dense<0.000000e+00> : vector<10x96xf32>
    %71 = tpu.matmul %68, %70, %cst_30 {dimension_numbers = #tpu.dot_dimension_numbers<[1], [0], [0], [1], [0, 0, 1, 1], [], []>} : vector<10x32xf32>, vector<32x96xf32>, vector<10x96xf32> -> vector<10x96xf32>
    %c0_31 = arith.constant 0 : index
    %c0_32 = arith.constant 0 : index
    %c0_33 = arith.constant 0 : index
    %72 = vector.load %arg6[%c0_31, %c0_32, %c0_33] : memref<2x1x96xf32, #tpu.memory_space<vmem>>, vector<1x1x96xf32>
    %73 = vector.shape_cast %72 : vector<1x1x96xf32> to vector<1x96xf32>
    %74 = vector.broadcast %73 : vector<1x96xf32> to vector<10x96xf32>
    %75 = arith.addf %71, %74 : vector<10x96xf32>
    %c0_34 = arith.constant 0 : index
    %c0_35 = arith.constant 0 : index
    %c0_36 = arith.constant 0 : index
    %76 = vector.load %arg7[%c0_34, %c0_35, %c0_36] : memref<2x32x32xf32, #tpu.memory_space<vmem>>, vector<1x32x32xf32>
    %77 = vector.shape_cast %76 : vector<1x32x32xf32> to vector<32x32xf32>
    %78 = vector.extract_strided_slice %75 {offsets = [0, 0], sizes = [10, 8], strides = [1, 1]} : vector<10x96xf32> to vector<10x8xf32>
    %79 = vector.extract_strided_slice %75 {offsets = [0, 32], sizes = [10, 8], strides = [1, 1]} : vector<10x96xf32> to vector<10x8xf32>
    %80 = vector.extract_strided_slice %75 {offsets = [0, 64], sizes = [10, 8], strides = [1, 1]} : vector<10x96xf32> to vector<10x8xf32>
    %cst_37 = arith.constant dense<0.000000e+00> : vector<10x10xf32>
    %81 = tpu.matmul %78, %79, %cst_37 {dimension_numbers = #tpu.dot_dimension_numbers<[1], [1], [0], [0], [0, 0, 1, 0], [], []>} : vector<10x8xf32>, vector<10x8xf32>, vector<10x10xf32> -> vector<10x10xf32>
    %cst_38 = arith.constant 0.353553385 : f32
    %82 = vector.broadcast %cst_38 : f32 to vector<10x10xf32>
    %83 = arith.mulf %81, %82 : vector<10x10xf32>
    %84 = arith.addf %83, %42 : vector<10x10xf32>
    %cst_39 = arith.constant dense<0xFF800000> : vector<10xf32>
    %85 = vector.multi_reduction <maximumf>, %84, %cst_39 [1] : vector<10x10xf32> to vector<10xf32>
    %86 = vector.shape_cast %85 : vector<10xf32> to vector<10x1xf32>
    %87 = vector.broadcast %86 : vector<10x1xf32> to vector<10x10xf32>
    %88 = arith.subf %84, %87 : vector<10x10xf32>
    %89 = math.exp %88 : vector<10x10xf32>
    %cst_40 = arith.constant dense<0.000000e+00> : vector<10xf32>
    %90 = vector.multi_reduction <add>, %89, %cst_40 [1] : vector<10x10xf32> to vector<10xf32>
    %91 = vector.shape_cast %90 : vector<10xf32> to vector<10x1xf32>
    %92 = tpu.reciprocal %91 {approx = true} : vector<10x1xf32> -> vector<10x1xf32>
    %93 = vector.broadcast %92 : vector<10x1xf32> to vector<10x10xf32>
    %94 = arith.mulf %89, %93 : vector<10x10xf32>
    %cst_41 = arith.constant dense<0.000000e+00> : vector<10x8xf32>
    %95 = tpu.matmul %94, %80, %cst_41 {dimension_numbers = #tpu.dot_dimension_numbers<[1], [0], [0], [1], [0, 0, 1, 1], [], []>} : vector<10x10xf32>, vector<10x8xf32>, vector<10x8xf32> -> vector<10x8xf32>
    %96 = vector.extract_strided_slice %77 {offsets = [0, 0], sizes = [8, 32], strides = [1, 1]} : vector<32x32xf32> to vector<8x32xf32>
    %cst_42 = arith.constant dense<0.000000e+00> : vector<10x32xf32>
    %97 = tpu.matmul %95, %96, %cst_42 {dimension_numbers = #tpu.dot_dimension_numbers<[1], [0], [0], [1], [0, 0, 1, 1], [], []>} : vector<10x8xf32>, vector<8x32xf32>, vector<10x32xf32> -> vector<10x32xf32>
    %98 = vector.extract_strided_slice %75 {offsets = [0, 8], sizes = [10, 8], strides = [1, 1]} : vector<10x96xf32> to vector<10x8xf32>
    %99 = vector.extract_strided_slice %75 {offsets = [0, 40], sizes = [10, 8], strides = [1, 1]} : vector<10x96xf32> to vector<10x8xf32>
    %100 = vector.extract_strided_slice %75 {offsets = [0, 72], sizes = [10, 8], strides = [1, 1]} : vector<10x96xf32> to vector<10x8xf32>
    %cst_43 = arith.constant dense<0.000000e+00> : vector<10x10xf32>
    %101 = tpu.matmul %98, %99, %cst_43 {dimension_numbers = #tpu.dot_dimension_numbers<[1], [1], [0], [0], [0, 0, 1, 0], [], []>} : vector<10x8xf32>, vector<10x8xf32>, vector<10x10xf32> -> vector<10x10xf32>
    %cst_44 = arith.constant 0.353553385 : f32
    %102 = vector.broadcast %cst_44 : f32 to vector<10x10xf32>
    %103 = arith.mulf %101, %102 : vector<10x10xf32>
    %104 = arith.addf %103, %42 : vector<10x10xf32>
    %cst_45 = arith.constant dense<0xFF800000> : vector<10xf32>
    %105 = vector.multi_reduction <maximumf>, %104, %cst_45 [1] : vector<10x10xf32> to vector<10xf32>
    %106 = vector.shape_cast %105 : vector<10xf32> to vector<10x1xf32>
    %107 = vector.broadcast %106 : vector<10x1xf32> to vector<10x10xf32>
    %108 = arith.subf %104, %107 : vector<10x10xf32>
    %109 = math.exp %108 : vector<10x10xf32>
    %cst_46 = arith.constant dense<0.000000e+00> : vector<10xf32>
    %110 = vector.multi_reduction <add>, %109, %cst_46 [1] : vector<10x10xf32> to vector<10xf32>
    %111 = vector.shape_cast %110 : vector<10xf32> to vector<10x1xf32>
    %112 = tpu.reciprocal %111 {approx = true} : vector<10x1xf32> -> vector<10x1xf32>
    %113 = vector.broadcast %112 : vector<10x1xf32> to vector<10x10xf32>
    %114 = arith.mulf %109, %113 : vector<10x10xf32>
    %cst_47 = arith.constant dense<0.000000e+00> : vector<10x8xf32>
    %115 = tpu.matmul %114, %100, %cst_47 {dimension_numbers = #tpu.dot_dimension_numbers<[1], [0], [0], [1], [0, 0, 1, 1], [], []>} : vector<10x10xf32>, vector<10x8xf32>, vector<10x8xf32> -> vector<10x8xf32>
    %116 = vector.extract_strided_slice %77 {offsets = [8, 0], sizes = [8, 32], strides = [1, 1]} : vector<32x32xf32> to vector<8x32xf32>
    %cst_48 = arith.constant dense<0.000000e+00> : vector<10x32xf32>
    %117 = tpu.matmul %115, %116, %cst_48 {dimension_numbers = #tpu.dot_dimension_numbers<[1], [0], [0], [1], [0, 0, 1, 1], [], []>} : vector<10x8xf32>, vector<8x32xf32>, vector<10x32xf32> -> vector<10x32xf32>
    %118 = arith.addf %97, %117 : vector<10x32xf32>
    %119 = vector.extract_strided_slice %75 {offsets = [0, 16], sizes = [10, 8], strides = [1, 1]} : vector<10x96xf32> to vector<10x8xf32>
    %120 = vector.extract_strided_slice %75 {offsets = [0, 48], sizes = [10, 8], strides = [1, 1]} : vector<10x96xf32> to vector<10x8xf32>
    %121 = vector.extract_strided_slice %75 {offsets = [0, 80], sizes = [10, 8], strides = [1, 1]} : vector<10x96xf32> to vector<10x8xf32>
    %cst_49 = arith.constant dense<0.000000e+00> : vector<10x10xf32>
    %122 = tpu.matmul %119, %120, %cst_49 {dimension_numbers = #tpu.dot_dimension_numbers<[1], [1], [0], [0], [0, 0, 1, 0], [], []>} : vector<10x8xf32>, vector<10x8xf32>, vector<10x10xf32> -> vector<10x10xf32>
    %cst_50 = arith.constant 0.353553385 : f32
    %123 = vector.broadcast %cst_50 : f32 to vector<10x10xf32>
    %124 = arith.mulf %122, %123 : vector<10x10xf32>
    %125 = arith.addf %124, %42 : vector<10x10xf32>
    %cst_51 = arith.constant dense<0xFF800000> : vector<10xf32>
    %126 = vector.multi_reduction <maximumf>, %125, %cst_51 [1] : vector<10x10xf32> to vector<10xf32>
    %127 = vector.shape_cast %126 : vector<10xf32> to vector<10x1xf32>
    %128 = vector.broadcast %127 : vector<10x1xf32> to vector<10x10xf32>
    %129 = arith.subf %125, %128 : vector<10x10xf32>
    %130 = math.exp %129 : vector<10x10xf32>
    %cst_52 = arith.constant dense<0.000000e+00> : vector<10xf32>
    %131 = vector.multi_reduction <add>, %130, %cst_52 [1] : vector<10x10xf32> to vector<10xf32>
    %132 = vector.shape_cast %131 : vector<10xf32> to vector<10x1xf32>
    %133 = tpu.reciprocal %132 {approx = true} : vector<10x1xf32> -> vector<10x1xf32>
    %134 = vector.broadcast %133 : vector<10x1xf32> to vector<10x10xf32>
    %135 = arith.mulf %130, %134 : vector<10x10xf32>
    %cst_53 = arith.constant dense<0.000000e+00> : vector<10x8xf32>
    %136 = tpu.matmul %135, %121, %cst_53 {dimension_numbers = #tpu.dot_dimension_numbers<[1], [0], [0], [1], [0, 0, 1, 1], [], []>} : vector<10x10xf32>, vector<10x8xf32>, vector<10x8xf32> -> vector<10x8xf32>
    %137 = vector.extract_strided_slice %77 {offsets = [16, 0], sizes = [8, 32], strides = [1, 1]} : vector<32x32xf32> to vector<8x32xf32>
    %cst_54 = arith.constant dense<0.000000e+00> : vector<10x32xf32>
    %138 = tpu.matmul %136, %137, %cst_54 {dimension_numbers = #tpu.dot_dimension_numbers<[1], [0], [0], [1], [0, 0, 1, 1], [], []>} : vector<10x8xf32>, vector<8x32xf32>, vector<10x32xf32> -> vector<10x32xf32>
    %139 = arith.addf %118, %138 : vector<10x32xf32>
    %140 = vector.extract_strided_slice %75 {offsets = [0, 24], sizes = [10, 8], strides = [1, 1]} : vector<10x96xf32> to vector<10x8xf32>
    %141 = vector.extract_strided_slice %75 {offsets = [0, 56], sizes = [10, 8], strides = [1, 1]} : vector<10x96xf32> to vector<10x8xf32>
    %142 = vector.extract_strided_slice %75 {offsets = [0, 88], sizes = [10, 8], strides = [1, 1]} : vector<10x96xf32> to vector<10x8xf32>
    %cst_55 = arith.constant dense<0.000000e+00> : vector<10x10xf32>
    %143 = tpu.matmul %140, %141, %cst_55 {dimension_numbers = #tpu.dot_dimension_numbers<[1], [1], [0], [0], [0, 0, 1, 0], [], []>} : vector<10x8xf32>, vector<10x8xf32>, vector<10x10xf32> -> vector<10x10xf32>
    %cst_56 = arith.constant 0.353553385 : f32
    %144 = vector.broadcast %cst_56 : f32 to vector<10x10xf32>
    %145 = arith.mulf %143, %144 : vector<10x10xf32>
    %146 = arith.addf %145, %42 : vector<10x10xf32>
    %cst_57 = arith.constant dense<0xFF800000> : vector<10xf32>
    %147 = vector.multi_reduction <maximumf>, %146, %cst_57 [1] : vector<10x10xf32> to vector<10xf32>
    %148 = vector.shape_cast %147 : vector<10xf32> to vector<10x1xf32>
    %149 = vector.broadcast %148 : vector<10x1xf32> to vector<10x10xf32>
    %150 = arith.subf %146, %149 : vector<10x10xf32>
    %151 = math.exp %150 : vector<10x10xf32>
    %cst_58 = arith.constant dense<0.000000e+00> : vector<10xf32>
    %152 = vector.multi_reduction <add>, %151, %cst_58 [1] : vector<10x10xf32> to vector<10xf32>
    %153 = vector.shape_cast %152 : vector<10xf32> to vector<10x1xf32>
    %154 = tpu.reciprocal %153 {approx = true} : vector<10x1xf32> -> vector<10x1xf32>
    %155 = vector.broadcast %154 : vector<10x1xf32> to vector<10x10xf32>
    %156 = arith.mulf %151, %155 : vector<10x10xf32>
    %cst_59 = arith.constant dense<0.000000e+00> : vector<10x8xf32>
    %157 = tpu.matmul %156, %142, %cst_59 {dimension_numbers = #tpu.dot_dimension_numbers<[1], [0], [0], [1], [0, 0, 1, 1], [], []>} : vector<10x10xf32>, vector<10x8xf32>, vector<10x8xf32> -> vector<10x8xf32>
    %158 = vector.extract_strided_slice %77 {offsets = [24, 0], sizes = [8, 32], strides = [1, 1]} : vector<32x32xf32> to vector<8x32xf32>
    %cst_60 = arith.constant dense<0.000000e+00> : vector<10x32xf32>
    %159 = tpu.matmul %157, %158, %cst_60 {dimension_numbers = #tpu.dot_dimension_numbers<[1], [0], [0], [1], [0, 0, 1, 1], [], []>} : vector<10x8xf32>, vector<8x32xf32>, vector<10x32xf32> -> vector<10x32xf32>
    %160 = arith.addf %139, %159 : vector<10x32xf32>
    %161 = arith.addf %4, %160 : vector<10x32xf32>
    %c0_61 = arith.constant 0 : index
    %c0_62 = arith.constant 0 : index
    %c0_63 = arith.constant 0 : index
    %162 = vector.load %arg8[%c0_61, %c0_62, %c0_63] : memref<2x1x32xf32, #tpu.memory_space<vmem>>, vector<1x1x32xf32>
    %163 = vector.shape_cast %162 : vector<1x1x32xf32> to vector<1x32xf32>
    %164 = vector.broadcast %163 : vector<1x32xf32> to vector<10x32xf32>
    %165 = arith.addf %161, %164 : vector<10x32xf32>
    %c0_64 = arith.constant 0 : index
    %c0_65 = arith.constant 0 : index
    %c0_66 = arith.constant 0 : index
    %166 = vector.load %arg9[%c0_64, %c0_65, %c0_66] : memref<2x1x32xf32, #tpu.memory_space<vmem>>, vector<1x1x32xf32>
    %167 = vector.shape_cast %166 : vector<1x1x32xf32> to vector<1x32xf32>
    %c0_67 = arith.constant 0 : index
    %c0_68 = arith.constant 0 : index
    %c0_69 = arith.constant 0 : index
    %168 = vector.load %arg10[%c0_67, %c0_68, %c0_69] : memref<2x1x32xf32, #tpu.memory_space<vmem>>, vector<1x1x32xf32>
    %169 = vector.shape_cast %168 : vector<1x1x32xf32> to vector<1x32xf32>
    %cst_70 = arith.constant dense<0.000000e+00> : vector<10xf32>
    %170 = vector.multi_reduction <add>, %165, %cst_70 [1] : vector<10x32xf32> to vector<10xf32>
    %171 = vector.shape_cast %170 : vector<10xf32> to vector<10x1xf32>
    %cst_71 = arith.constant 3.200000e+01 : f32
    %172 = vector.broadcast %cst_71 : f32 to vector<10x1xf32>
    %173 = arith.divf %171, %172 : vector<10x1xf32>
    %174 = vector.broadcast %173 : vector<10x1xf32> to vector<10x32xf32>
    %175 = arith.subf %165, %174 : vector<10x32xf32>
    %176 = arith.mulf %175, %175 : vector<10x32xf32>
    %cst_72 = arith.constant dense<0.000000e+00> : vector<10xf32>
    %177 = vector.multi_reduction <add>, %176, %cst_72 [1] : vector<10x32xf32> to vector<10xf32>
    %178 = vector.shape_cast %177 : vector<10xf32> to vector<10x1xf32>
    %cst_73 = arith.constant 3.200000e+01 : f32
    %179 = vector.broadcast %cst_73 : f32 to vector<10x1xf32>
    %180 = arith.divf %178, %179 : vector<10x1xf32>
    %181 = vector.broadcast %173 : vector<10x1xf32> to vector<10x32xf32>
    %182 = arith.subf %165, %181 : vector<10x32xf32>
    %cst_74 = arith.constant 9.99999997E-7 : f32
    %183 = vector.broadcast %cst_74 : f32 to vector<10x1xf32>
    %184 = arith.addf %180, %183 : vector<10x1xf32>
    %185 = math.rsqrt %184 : vector<10x1xf32>
    %186 = vector.broadcast %185 : vector<10x1xf32> to vector<10x32xf32>
    %187 = arith.mulf %182, %186 : vector<10x32xf32>
    %188 = vector.broadcast %167 : vector<1x32xf32> to vector<10x32xf32>
    %189 = arith.mulf %187, %188 : vector<10x32xf32>
    %190 = vector.broadcast %169 : vector<1x32xf32> to vector<10x32xf32>
    %191 = arith.addf %189, %190 : vector<10x32xf32>
    %c0_75 = arith.constant 0 : index
    %c0_76 = arith.constant 0 : index
    %c0_77 = arith.constant 0 : index
    %192 = vector.load %arg11[%c0_75, %c0_76, %c0_77] : memref<2x32x64xf32, #tpu.memory_space<vmem>>, vector<1x32x64xf32>
    %193 = vector.shape_cast %192 : vector<1x32x64xf32> to vector<32x64xf32>
    %cst_78 = arith.constant dense<0.000000e+00> : vector<10x64xf32>
    %194 = tpu.matmul %191, %193, %cst_78 {dimension_numbers = #tpu.dot_dimension_numbers<[1], [0], [0], [1], [0, 0, 1, 1], [], []>} : vector<10x32xf32>, vector<32x64xf32>, vector<10x64xf32> -> vector<10x64xf32>
    %c0_79 = arith.constant 0 : index
    %c0_80 = arith.constant 0 : index
    %c0_81 = arith.constant 0 : index
    %195 = vector.load %arg12[%c0_79, %c0_80, %c0_81] : memref<2x1x64xf32, #tpu.memory_space<vmem>>, vector<1x1x64xf32>
    %196 = vector.shape_cast %195 : vector<1x1x64xf32> to vector<1x64xf32>
    %197 = vector.broadcast %196 : vector<1x64xf32> to vector<10x64xf32>
    %198 = arith.addf %194, %197 : vector<10x64xf32>
    %cst_82 = arith.constant 5.000000e-01 : f32
    %199 = vector.broadcast %cst_82 : f32 to vector<10x64xf32>
    %200 = arith.mulf %199, %198 : vector<10x64xf32>
    %cst_83 = arith.constant 0.707106769 : f32
    %201 = vector.broadcast %cst_83 : f32 to vector<10x64xf32>
    %202 = arith.mulf %198, %201 : vector<10x64xf32>
    %203 = math.erf %202 : vector<10x64xf32>
    %cst_84 = arith.constant 1.000000e+00 : f32
    %204 = vector.broadcast %cst_84 : f32 to vector<10x64xf32>
    %205 = arith.addf %204, %203 : vector<10x64xf32>
    %206 = arith.mulf %200, %205 : vector<10x64xf32>
    %c0_85 = arith.constant 0 : index
    %c0_86 = arith.constant 0 : index
    %c0_87 = arith.constant 0 : index
    %207 = vector.load %arg13[%c0_85, %c0_86, %c0_87] : memref<2x64x32xf32, #tpu.memory_space<vmem>>, vector<1x64x32xf32>
    %208 = vector.shape_cast %207 : vector<1x64x32xf32> to vector<64x32xf32>
    %cst_88 = arith.constant dense<0.000000e+00> : vector<10x32xf32>
    %209 = tpu.matmul %206, %208, %cst_88 {dimension_numbers = #tpu.dot_dimension_numbers<[1], [0], [0], [1], [0, 0, 1, 1], [], []>} : vector<10x64xf32>, vector<64x32xf32>, vector<10x32xf32> -> vector<10x32xf32>
    %210 = arith.addf %165, %209 : vector<10x32xf32>
    %c0_89 = arith.constant 0 : index
    %c0_90 = arith.constant 0 : index
    %c0_91 = arith.constant 0 : index
    %211 = vector.load %arg14[%c0_89, %c0_90, %c0_91] : memref<2x1x32xf32, #tpu.memory_space<vmem>>, vector<1x1x32xf32>
    %212 = vector.shape_cast %211 : vector<1x1x32xf32> to vector<1x32xf32>
    %213 = vector.broadcast %212 : vector<1x32xf32> to vector<10x32xf32>
    %214 = arith.addf %210, %213 : vector<10x32xf32>
    %c1 = arith.constant 1 : index
    %c0_92 = arith.constant 0 : index
    %c0_93 = arith.constant 0 : index
    %215 = vector.load %arg3[%c1, %c0_92, %c0_93] : memref<2x1x32xf32, #tpu.memory_space<vmem>>, vector<1x1x32xf32>
    %216 = vector.shape_cast %215 : vector<1x1x32xf32> to vector<1x32xf32>
    %c1_94 = arith.constant 1 : index
    %c0_95 = arith.constant 0 : index
    %c0_96 = arith.constant 0 : index
    %217 = vector.load %arg4[%c1_94, %c0_95, %c0_96] : memref<2x1x32xf32, #tpu.memory_space<vmem>>, vector<1x1x32xf32>
    %218 = vector.shape_cast %217 : vector<1x1x32xf32> to vector<1x32xf32>
    %cst_97 = arith.constant dense<0.000000e+00> : vector<10xf32>
    %219 = vector.multi_reduction <add>, %214, %cst_97 [1] : vector<10x32xf32> to vector<10xf32>
    %220 = vector.shape_cast %219 : vector<10xf32> to vector<10x1xf32>
    %cst_98 = arith.constant 3.200000e+01 : f32
    %221 = vector.broadcast %cst_98 : f32 to vector<10x1xf32>
    %222 = arith.divf %220, %221 : vector<10x1xf32>
    %223 = vector.broadcast %222 : vector<10x1xf32> to vector<10x32xf32>
    %224 = arith.subf %214, %223 : vector<10x32xf32>
    %225 = arith.mulf %224, %224 : vector<10x32xf32>
    %cst_99 = arith.constant dense<0.000000e+00> : vector<10xf32>
    %226 = vector.multi_reduction <add>, %225, %cst_99 [1] : vector<10x32xf32> to vector<10xf32>
    %227 = vector.shape_cast %226 : vector<10xf32> to vector<10x1xf32>
    %cst_100 = arith.constant 3.200000e+01 : f32
    %228 = vector.broadcast %cst_100 : f32 to vector<10x1xf32>
    %229 = arith.divf %227, %228 : vector<10x1xf32>
    %230 = vector.broadcast %222 : vector<10x1xf32> to vector<10x32xf32>
    %231 = arith.subf %214, %230 : vector<10x32xf32>
    %cst_101 = arith.constant 9.99999997E-7 : f32
    %232 = vector.broadcast %cst_101 : f32 to vector<10x1xf32>
    %233 = arith.addf %229, %232 : vector<10x1xf32>
    %234 = math.rsqrt %233 : vector<10x1xf32>
    %235 = vector.broadcast %234 : vector<10x1xf32> to vector<10x32xf32>
    %236 = arith.mulf %231, %235 : vector<10x32xf32>
    %237 = vector.broadcast %216 : vector<1x32xf32> to vector<10x32xf32>
    %238 = arith.mulf %236, %237 : vector<10x32xf32>
    %239 = vector.broadcast %218 : vector<1x32xf32> to vector<10x32xf32>
    %240 = arith.addf %238, %239 : vector<10x32xf32>
    %c1_102 = arith.constant 1 : index
    %c0_103 = arith.constant 0 : index
    %c0_104 = arith.constant 0 : index
    %241 = vector.load %arg5[%c1_102, %c0_103, %c0_104] : memref<2x32x96xf32, #tpu.memory_space<vmem>>, vector<1x32x96xf32>
    %242 = vector.shape_cast %241 : vector<1x32x96xf32> to vector<32x96xf32>
    %cst_105 = arith.constant dense<0.000000e+00> : vector<10x96xf32>
    %243 = tpu.matmul %240, %242, %cst_105 {dimension_numbers = #tpu.dot_dimension_numbers<[1], [0], [0], [1], [0, 0, 1, 1], [], []>} : vector<10x32xf32>, vector<32x96xf32>, vector<10x96xf32> -> vector<10x96xf32>
    %c1_106 = arith.constant 1 : index
    %c0_107 = arith.constant 0 : index
    %c0_108 = arith.constant 0 : index
    %244 = vector.load %arg6[%c1_106, %c0_107, %c0_108] : memref<2x1x96xf32, #tpu.memory_space<vmem>>, vector<1x1x96xf32>
    %245 = vector.shape_cast %244 : vector<1x1x96xf32> to vector<1x96xf32>
    %246 = vector.broadcast %245 : vector<1x96xf32> to vector<10x96xf32>
    %247 = arith.addf %243, %246 : vector<10x96xf32>
    %c1_109 = arith.constant 1 : index
    %c0_110 = arith.constant 0 : index
    %c0_111 = arith.constant 0 : index
    %248 = vector.load %arg7[%c1_109, %c0_110, %c0_111] : memref<2x32x32xf32, #tpu.memory_space<vmem>>, vector<1x32x32xf32>
    %249 = vector.shape_cast %248 : vector<1x32x32xf32> to vector<32x32xf32>
    %250 = vector.extract_strided_slice %247 {offsets = [0, 0], sizes = [10, 8], strides = [1, 1]} : vector<10x96xf32> to vector<10x8xf32>
    %251 = vector.extract_strided_slice %247 {offsets = [0, 32], sizes = [10, 8], strides = [1, 1]} : vector<10x96xf32> to vector<10x8xf32>
    %252 = vector.extract_strided_slice %247 {offsets = [0, 64], sizes = [10, 8], strides = [1, 1]} : vector<10x96xf32> to vector<10x8xf32>
    %cst_112 = arith.constant dense<0.000000e+00> : vector<10x10xf32>
    %253 = tpu.matmul %250, %251, %cst_112 {dimension_numbers = #tpu.dot_dimension_numbers<[1], [1], [0], [0], [0, 0, 1, 0], [], []>} : vector<10x8xf32>, vector<10x8xf32>, vector<10x10xf32> -> vector<10x10xf32>
    %cst_113 = arith.constant 0.353553385 : f32
    %254 = vector.broadcast %cst_113 : f32 to vector<10x10xf32>
    %255 = arith.mulf %253, %254 : vector<10x10xf32>
    %256 = arith.addf %255, %42 : vector<10x10xf32>
    %cst_114 = arith.constant dense<0xFF800000> : vector<10xf32>
    %257 = vector.multi_reduction <maximumf>, %256, %cst_114 [1] : vector<10x10xf32> to vector<10xf32>
    %258 = vector.shape_cast %257 : vector<10xf32> to vector<10x1xf32>
    %259 = vector.broadcast %258 : vector<10x1xf32> to vector<10x10xf32>
    %260 = arith.subf %256, %259 : vector<10x10xf32>
    %261 = math.exp %260 : vector<10x10xf32>
    %cst_115 = arith.constant dense<0.000000e+00> : vector<10xf32>
    %262 = vector.multi_reduction <add>, %261, %cst_115 [1] : vector<10x10xf32> to vector<10xf32>
    %263 = vector.shape_cast %262 : vector<10xf32> to vector<10x1xf32>
    %264 = tpu.reciprocal %263 {approx = true} : vector<10x1xf32> -> vector<10x1xf32>
    %265 = vector.broadcast %264 : vector<10x1xf32> to vector<10x10xf32>
    %266 = arith.mulf %261, %265 : vector<10x10xf32>
    %cst_116 = arith.constant dense<0.000000e+00> : vector<10x8xf32>
    %267 = tpu.matmul %266, %252, %cst_116 {dimension_numbers = #tpu.dot_dimension_numbers<[1], [0], [0], [1], [0, 0, 1, 1], [], []>} : vector<10x10xf32>, vector<10x8xf32>, vector<10x8xf32> -> vector<10x8xf32>
    %268 = vector.extract_strided_slice %249 {offsets = [0, 0], sizes = [8, 32], strides = [1, 1]} : vector<32x32xf32> to vector<8x32xf32>
    %cst_117 = arith.constant dense<0.000000e+00> : vector<10x32xf32>
    %269 = tpu.matmul %267, %268, %cst_117 {dimension_numbers = #tpu.dot_dimension_numbers<[1], [0], [0], [1], [0, 0, 1, 1], [], []>} : vector<10x8xf32>, vector<8x32xf32>, vector<10x32xf32> -> vector<10x32xf32>
    %270 = vector.extract_strided_slice %247 {offsets = [0, 8], sizes = [10, 8], strides = [1, 1]} : vector<10x96xf32> to vector<10x8xf32>
    %271 = vector.extract_strided_slice %247 {offsets = [0, 40], sizes = [10, 8], strides = [1, 1]} : vector<10x96xf32> to vector<10x8xf32>
    %272 = vector.extract_strided_slice %247 {offsets = [0, 72], sizes = [10, 8], strides = [1, 1]} : vector<10x96xf32> to vector<10x8xf32>
    %cst_118 = arith.constant dense<0.000000e+00> : vector<10x10xf32>
    %273 = tpu.matmul %270, %271, %cst_118 {dimension_numbers = #tpu.dot_dimension_numbers<[1], [1], [0], [0], [0, 0, 1, 0], [], []>} : vector<10x8xf32>, vector<10x8xf32>, vector<10x10xf32> -> vector<10x10xf32>
    %cst_119 = arith.constant 0.353553385 : f32
    %274 = vector.broadcast %cst_119 : f32 to vector<10x10xf32>
    %275 = arith.mulf %273, %274 : vector<10x10xf32>
    %276 = arith.addf %275, %42 : vector<10x10xf32>
    %cst_120 = arith.constant dense<0xFF800000> : vector<10xf32>
    %277 = vector.multi_reduction <maximumf>, %276, %cst_120 [1] : vector<10x10xf32> to vector<10xf32>
    %278 = vector.shape_cast %277 : vector<10xf32> to vector<10x1xf32>
    %279 = vector.broadcast %278 : vector<10x1xf32> to vector<10x10xf32>
    %280 = arith.subf %276, %279 : vector<10x10xf32>
    %281 = math.exp %280 : vector<10x10xf32>
    %cst_121 = arith.constant dense<0.000000e+00> : vector<10xf32>
    %282 = vector.multi_reduction <add>, %281, %cst_121 [1] : vector<10x10xf32> to vector<10xf32>
    %283 = vector.shape_cast %282 : vector<10xf32> to vector<10x1xf32>
    %284 = tpu.reciprocal %283 {approx = true} : vector<10x1xf32> -> vector<10x1xf32>
    %285 = vector.broadcast %284 : vector<10x1xf32> to vector<10x10xf32>
    %286 = arith.mulf %281, %285 : vector<10x10xf32>
    %cst_122 = arith.constant dense<0.000000e+00> : vector<10x8xf32>
    %287 = tpu.matmul %286, %272, %cst_122 {dimension_numbers = #tpu.dot_dimension_numbers<[1], [0], [0], [1], [0, 0, 1, 1], [], []>} : vector<10x10xf32>, vector<10x8xf32>, vector<10x8xf32> -> vector<10x8xf32>
    %288 = vector.extract_strided_slice %249 {offsets = [8, 0], sizes = [8, 32], strides = [1, 1]} : vector<32x32xf32> to vector<8x32xf32>
    %cst_123 = arith.constant dense<0.000000e+00> : vector<10x32xf32>
    %289 = tpu.matmul %287, %288, %cst_123 {dimension_numbers = #tpu.dot_dimension_numbers<[1], [0], [0], [1], [0, 0, 1, 1], [], []>} : vector<10x8xf32>, vector<8x32xf32>, vector<10x32xf32> -> vector<10x32xf32>
    %290 = arith.addf %269, %289 : vector<10x32xf32>
    %291 = vector.extract_strided_slice %247 {offsets = [0, 16], sizes = [10, 8], strides = [1, 1]} : vector<10x96xf32> to vector<10x8xf32>
    %292 = vector.extract_strided_slice %247 {offsets = [0, 48], sizes = [10, 8], strides = [1, 1]} : vector<10x96xf32> to vector<10x8xf32>
    %293 = vector.extract_strided_slice %247 {offsets = [0, 80], sizes = [10, 8], strides = [1, 1]} : vector<10x96xf32> to vector<10x8xf32>
    %cst_124 = arith.constant dense<0.000000e+00> : vector<10x10xf32>
    %294 = tpu.matmul %291, %292, %cst_124 {dimension_numbers = #tpu.dot_dimension_numbers<[1], [1], [0], [0], [0, 0, 1, 0], [], []>} : vector<10x8xf32>, vector<10x8xf32>, vector<10x10xf32> -> vector<10x10xf32>
    %cst_125 = arith.constant 0.353553385 : f32
    %295 = vector.broadcast %cst_125 : f32 to vector<10x10xf32>
    %296 = arith.mulf %294, %295 : vector<10x10xf32>
    %297 = arith.addf %296, %42 : vector<10x10xf32>
    %cst_126 = arith.constant dense<0xFF800000> : vector<10xf32>
    %298 = vector.multi_reduction <maximumf>, %297, %cst_126 [1] : vector<10x10xf32> to vector<10xf32>
    %299 = vector.shape_cast %298 : vector<10xf32> to vector<10x1xf32>
    %300 = vector.broadcast %299 : vector<10x1xf32> to vector<10x10xf32>
    %301 = arith.subf %297, %300 : vector<10x10xf32>
    %302 = math.exp %301 : vector<10x10xf32>
    %cst_127 = arith.constant dense<0.000000e+00> : vector<10xf32>
    %303 = vector.multi_reduction <add>, %302, %cst_127 [1] : vector<10x10xf32> to vector<10xf32>
    %304 = vector.shape_cast %303 : vector<10xf32> to vector<10x1xf32>
    %305 = tpu.reciprocal %304 {approx = true} : vector<10x1xf32> -> vector<10x1xf32>
    %306 = vector.broadcast %305 : vector<10x1xf32> to vector<10x10xf32>
    %307 = arith.mulf %302, %306 : vector<10x10xf32>
    %cst_128 = arith.constant dense<0.000000e+00> : vector<10x8xf32>
    %308 = tpu.matmul %307, %293, %cst_128 {dimension_numbers = #tpu.dot_dimension_numbers<[1], [0], [0], [1], [0, 0, 1, 1], [], []>} : vector<10x10xf32>, vector<10x8xf32>, vector<10x8xf32> -> vector<10x8xf32>
    %309 = vector.extract_strided_slice %249 {offsets = [16, 0], sizes = [8, 32], strides = [1, 1]} : vector<32x32xf32> to vector<8x32xf32>
    %cst_129 = arith.constant dense<0.000000e+00> : vector<10x32xf32>
    %310 = tpu.matmul %308, %309, %cst_129 {dimension_numbers = #tpu.dot_dimension_numbers<[1], [0], [0], [1], [0, 0, 1, 1], [], []>} : vector<10x8xf32>, vector<8x32xf32>, vector<10x32xf32> -> vector<10x32xf32>
    %311 = arith.addf %290, %310 : vector<10x32xf32>
    %312 = vector.extract_strided_slice %247 {offsets = [0, 24], sizes = [10, 8], strides = [1, 1]} : vector<10x96xf32> to vector<10x8xf32>
    %313 = vector.extract_strided_slice %247 {offsets = [0, 56], sizes = [10, 8], strides = [1, 1]} : vector<10x96xf32> to vector<10x8xf32>
    %314 = vector.extract_strided_slice %247 {offsets = [0, 88], sizes = [10, 8], strides = [1, 1]} : vector<10x96xf32> to vector<10x8xf32>
    %cst_130 = arith.constant dense<0.000000e+00> : vector<10x10xf32>
    %315 = tpu.matmul %312, %313, %cst_130 {dimension_numbers = #tpu.dot_dimension_numbers<[1], [1], [0], [0], [0, 0, 1, 0], [], []>} : vector<10x8xf32>, vector<10x8xf32>, vector<10x10xf32> -> vector<10x10xf32>
    %cst_131 = arith.constant 0.353553385 : f32
    %316 = vector.broadcast %cst_131 : f32 to vector<10x10xf32>
    %317 = arith.mulf %315, %316 : vector<10x10xf32>
    %318 = arith.addf %317, %42 : vector<10x10xf32>
    %cst_132 = arith.constant dense<0xFF800000> : vector<10xf32>
    %319 = vector.multi_reduction <maximumf>, %318, %cst_132 [1] : vector<10x10xf32> to vector<10xf32>
    %320 = vector.shape_cast %319 : vector<10xf32> to vector<10x1xf32>
    %321 = vector.broadcast %320 : vector<10x1xf32> to vector<10x10xf32>
    %322 = arith.subf %318, %321 : vector<10x10xf32>
    %323 = math.exp %322 : vector<10x10xf32>
    %cst_133 = arith.constant dense<0.000000e+00> : vector<10xf32>
    %324 = vector.multi_reduction <add>, %323, %cst_133 [1] : vector<10x10xf32> to vector<10xf32>
    %325 = vector.shape_cast %324 : vector<10xf32> to vector<10x1xf32>
    %326 = tpu.reciprocal %325 {approx = true} : vector<10x1xf32> -> vector<10x1xf32>
    %327 = vector.broadcast %326 : vector<10x1xf32> to vector<10x10xf32>
    %328 = arith.mulf %323, %327 : vector<10x10xf32>
    %cst_134 = arith.constant dense<0.000000e+00> : vector<10x8xf32>
    %329 = tpu.matmul %328, %314, %cst_134 {dimension_numbers = #tpu.dot_dimension_numbers<[1], [0], [0], [1], [0, 0, 1, 1], [], []>} : vector<10x10xf32>, vector<10x8xf32>, vector<10x8xf32> -> vector<10x8xf32>
    %330 = vector.extract_strided_slice %249 {offsets = [24, 0], sizes = [8, 32], strides = [1, 1]} : vector<32x32xf32> to vector<8x32xf32>
    %cst_135 = arith.constant dense<0.000000e+00> : vector<10x32xf32>
    %331 = tpu.matmul %329, %330, %cst_135 {dimension_numbers = #tpu.dot_dimension_numbers<[1], [0], [0], [1], [0, 0, 1, 1], [], []>} : vector<10x8xf32>, vector<8x32xf32>, vector<10x32xf32> -> vector<10x32xf32>
    %332 = arith.addf %311, %331 : vector<10x32xf32>
    %333 = arith.addf %214, %332 : vector<10x32xf32>
    %c1_136 = arith.constant 1 : index
    %c0_137 = arith.constant 0 : index
    %c0_138 = arith.constant 0 : index
    %334 = vector.load %arg8[%c1_136, %c0_137, %c0_138] : memref<2x1x32xf32, #tpu.memory_space<vmem>>, vector<1x1x32xf32>
    %335 = vector.shape_cast %334 : vector<1x1x32xf32> to vector<1x32xf32>
    %336 = vector.broadcast %335 : vector<1x32xf32> to vector<10x32xf32>
    %337 = arith.addf %333, %336 : vector<10x32xf32>
    %c1_139 = arith.constant 1 : index
    %c0_140 = arith.constant 0 : index
    %c0_141 = arith.constant 0 : index
    %338 = vector.load %arg9[%c1_139, %c0_140, %c0_141] : memref<2x1x32xf32, #tpu.memory_space<vmem>>, vector<1x1x32xf32>
    %339 = vector.shape_cast %338 : vector<1x1x32xf32> to vector<1x32xf32>
    %c1_142 = arith.constant 1 : index
    %c0_143 = arith.constant 0 : index
    %c0_144 = arith.constant 0 : index
    %340 = vector.load %arg10[%c1_142, %c0_143, %c0_144] : memref<2x1x32xf32, #tpu.memory_space<vmem>>, vector<1x1x32xf32>
    %341 = vector.shape_cast %340 : vector<1x1x32xf32> to vector<1x32xf32>
    %cst_145 = arith.constant dense<0.000000e+00> : vector<10xf32>
    %342 = vector.multi_reduction <add>, %337, %cst_145 [1] : vector<10x32xf32> to vector<10xf32>
    %343 = vector.shape_cast %342 : vector<10xf32> to vector<10x1xf32>
    %cst_146 = arith.constant 3.200000e+01 : f32
    %344 = vector.broadcast %cst_146 : f32 to vector<10x1xf32>
    %345 = arith.divf %343, %344 : vector<10x1xf32>
    %346 = vector.broadcast %345 : vector<10x1xf32> to vector<10x32xf32>
    %347 = arith.subf %337, %346 : vector<10x32xf32>
    %348 = arith.mulf %347, %347 : vector<10x32xf32>
    %cst_147 = arith.constant dense<0.000000e+00> : vector<10xf32>
    %349 = vector.multi_reduction <add>, %348, %cst_147 [1] : vector<10x32xf32> to vector<10xf32>
    %350 = vector.shape_cast %349 : vector<10xf32> to vector<10x1xf32>
    %cst_148 = arith.constant 3.200000e+01 : f32
    %351 = vector.broadcast %cst_148 : f32 to vector<10x1xf32>
    %352 = arith.divf %350, %351 : vector<10x1xf32>
    %353 = vector.broadcast %345 : vector<10x1xf32> to vector<10x32xf32>
    %354 = arith.subf %337, %353 : vector<10x32xf32>
    %cst_149 = arith.constant 9.99999997E-7 : f32
    %355 = vector.broadcast %cst_149 : f32 to vector<10x1xf32>
    %356 = arith.addf %352, %355 : vector<10x1xf32>
    %357 = math.rsqrt %356 : vector<10x1xf32>
    %358 = vector.broadcast %357 : vector<10x1xf32> to vector<10x32xf32>
    %359 = arith.mulf %354, %358 : vector<10x32xf32>
    %360 = vector.broadcast %339 : vector<1x32xf32> to vector<10x32xf32>
    %361 = arith.mulf %359, %360 : vector<10x32xf32>
    %362 = vector.broadcast %341 : vector<1x32xf32> to vector<10x32xf32>
    %363 = arith.addf %361, %362 : vector<10x32xf32>
    %c1_150 = arith.constant 1 : index
    %c0_151 = arith.constant 0 : index
    %c0_152 = arith.constant 0 : index
    %364 = vector.load %arg11[%c1_150, %c0_151, %c0_152] : memref<2x32x64xf32, #tpu.memory_space<vmem>>, vector<1x32x64xf32>
    %365 = vector.shape_cast %364 : vector<1x32x64xf32> to vector<32x64xf32>
    %cst_153 = arith.constant dense<0.000000e+00> : vector<10x64xf32>
    %366 = tpu.matmul %363, %365, %cst_153 {dimension_numbers = #tpu.dot_dimension_numbers<[1], [0], [0], [1], [0, 0, 1, 1], [], []>} : vector<10x32xf32>, vector<32x64xf32>, vector<10x64xf32> -> vector<10x64xf32>
    %c1_154 = arith.constant 1 : index
    %c0_155 = arith.constant 0 : index
    %c0_156 = arith.constant 0 : index
    %367 = vector.load %arg12[%c1_154, %c0_155, %c0_156] : memref<2x1x64xf32, #tpu.memory_space<vmem>>, vector<1x1x64xf32>
    %368 = vector.shape_cast %367 : vector<1x1x64xf32> to vector<1x64xf32>
    %369 = vector.broadcast %368 : vector<1x64xf32> to vector<10x64xf32>
    %370 = arith.addf %366, %369 : vector<10x64xf32>
    %cst_157 = arith.constant 5.000000e-01 : f32
    %371 = vector.broadcast %cst_157 : f32 to vector<10x64xf32>
    %372 = arith.mulf %371, %370 : vector<10x64xf32>
    %cst_158 = arith.constant 0.707106769 : f32
    %373 = vector.broadcast %cst_158 : f32 to vector<10x64xf32>
    %374 = arith.mulf %370, %373 : vector<10x64xf32>
    %375 = math.erf %374 : vector<10x64xf32>
    %cst_159 = arith.constant 1.000000e+00 : f32
    %376 = vector.broadcast %cst_159 : f32 to vector<10x64xf32>
    %377 = arith.addf %376, %375 : vector<10x64xf32>
    %378 = arith.mulf %372, %377 : vector<10x64xf32>
    %c1_160 = arith.constant 1 : index
    %c0_161 = arith.constant 0 : index
    %c0_162 = arith.constant 0 : index
    %379 = vector.load %arg13[%c1_160, %c0_161, %c0_162] : memref<2x64x32xf32, #tpu.memory_space<vmem>>, vector<1x64x32xf32>
    %380 = vector.shape_cast %379 : vector<1x64x32xf32> to vector<64x32xf32>
    %cst_163 = arith.constant dense<0.000000e+00> : vector<10x32xf32>
    %381 = tpu.matmul %378, %380, %cst_163 {dimension_numbers = #tpu.dot_dimension_numbers<[1], [0], [0], [1], [0, 0, 1, 1], [], []>} : vector<10x64xf32>, vector<64x32xf32>, vector<10x32xf32> -> vector<10x32xf32>
    %382 = arith.addf %337, %381 : vector<10x32xf32>
    %c1_164 = arith.constant 1 : index
    %c0_165 = arith.constant 0 : index
    %c0_166 = arith.constant 0 : index
    %383 = vector.load %arg14[%c1_164, %c0_165, %c0_166] : memref<2x1x32xf32, #tpu.memory_space<vmem>>, vector<1x1x32xf32>
    %384 = vector.shape_cast %383 : vector<1x1x32xf32> to vector<1x32xf32>
    %385 = vector.broadcast %384 : vector<1x32xf32> to vector<10x32xf32>
    %386 = arith.addf %382, %385 : vector<10x32xf32>
    %387 = vector.extract_strided_slice %386 {offsets = [0, 0], sizes = [2, 32], strides = [1, 1]} : vector<10x32xf32> to vector<2x32xf32>
    %c0_167 = arith.constant 0 : index
    %c0_168 = arith.constant 0 : index
    %388 = vector.load %arg15[%c0_167, %c0_168] : memref<1x32xf32, #tpu.memory_space<vmem>>, vector<1x32xf32>
    %c0_169 = arith.constant 0 : index
    %c0_170 = arith.constant 0 : index
    %389 = vector.load %arg16[%c0_169, %c0_170] : memref<1x32xf32, #tpu.memory_space<vmem>>, vector<1x32xf32>
    %cst_171 = arith.constant dense<0.000000e+00> : vector<2xf32>
    %390 = vector.multi_reduction <add>, %387, %cst_171 [1] : vector<2x32xf32> to vector<2xf32>
    %391 = vector.shape_cast %390 : vector<2xf32> to vector<2x1xf32>
    %cst_172 = arith.constant 3.200000e+01 : f32
    %392 = vector.broadcast %cst_172 : f32 to vector<2x1xf32>
    %393 = arith.divf %391, %392 : vector<2x1xf32>
    %394 = vector.broadcast %393 : vector<2x1xf32> to vector<2x32xf32>
    %395 = arith.subf %387, %394 : vector<2x32xf32>
    %396 = arith.mulf %395, %395 : vector<2x32xf32>
    %cst_173 = arith.constant dense<0.000000e+00> : vector<2xf32>
    %397 = vector.multi_reduction <add>, %396, %cst_173 [1] : vector<2x32xf32> to vector<2xf32>
    %398 = vector.shape_cast %397 : vector<2xf32> to vector<2x1xf32>
    %cst_174 = arith.constant 3.200000e+01 : f32
    %399 = vector.broadcast %cst_174 : f32 to vector<2x1xf32>
    %400 = arith.divf %398, %399 : vector<2x1xf32>
    %401 = vector.broadcast %393 : vector<2x1xf32> to vector<2x32xf32>
    %402 = arith.subf %387, %401 : vector<2x32xf32>
    %cst_175 = arith.constant 9.99999997E-7 : f32
    %403 = vector.broadcast %cst_175 : f32 to vector<2x1xf32>
    %404 = arith.addf %400, %403 : vector<2x1xf32>
    %405 = math.rsqrt %404 : vector<2x1xf32>
    %406 = vector.broadcast %405 : vector<2x1xf32> to vector<2x32xf32>
    %407 = arith.mulf %402, %406 : vector<2x32xf32>
    %408 = vector.broadcast %388 : vector<1x32xf32> to vector<2x32xf32>
    %409 = arith.mulf %407, %408 : vector<2x32xf32>
    %410 = vector.broadcast %389 : vector<1x32xf32> to vector<2x32xf32>
    %411 = arith.addf %409, %410 : vector<2x32xf32>
    %c0_176 = arith.constant 0 : index
    %c0_177 = arith.constant 0 : index
    %412 = vector.load %arg17[%c0_176, %c0_177] : memref<32x8xf32, #tpu.memory_space<vmem>>, vector<32x8xf32>
    %cst_178 = arith.constant dense<0.000000e+00> : vector<2x8xf32>
    %413 = tpu.matmul %411, %412, %cst_178 {dimension_numbers = #tpu.dot_dimension_numbers<[1], [0], [0], [1], [0, 0, 1, 1], [], []>} : vector<2x32xf32>, vector<32x8xf32>, vector<2x8xf32> -> vector<2x8xf32>
    %c0_179 = arith.constant 0 : index
    %c0_180 = arith.constant 0 : index
    %414 = vector.load %arg18[%c0_179, %c0_180] : memref<1x8xf32, #tpu.memory_space<vmem>>, vector<1x8xf32>
    %415 = vector.broadcast %414 : vector<1x8xf32> to vector<2x8xf32>
    %416 = arith.addf %413, %415 : vector<2x8xf32>
    %c0_181 = arith.constant 0 : index
    %c0_182 = arith.constant 0 : index
    %417 = vector.load %arg19[%c0_181, %c0_182] : memref<2x8xf32, #tpu.memory_space<vmem>>, vector<2x8xf32>
    tpu.vector_store %arg19[%c0_181, %c0_182], %416 {strides = array<i32>} : memref<2x8xf32, #tpu.memory_space<vmem>>, vector<2x8xf32>,
    return
  }
}

</mosaic_0001>

<bundles_post_ra>
// kernel: _vit_forward_impl.1
= control target key start
LH: loop header
LB: loop body
LE: loop exit
PB: predicated region body
PF: predicated region fallthrough
CT: control target
= control target key end

     0   :  { %s4879_s0 = inlined_call_operand.vmem [shape: f32[10,256], index: 0, kind: input, shape index: {}]   ;;  %s4880_s1 = inlined_call_operand.vmem [shape: f32[10,32], index: 1, kind: input, shape index: {}]   ;;  %s4881_s2 = inlined_call_operand.vmem [shape: f32[256,32], index: 2, kind: input, shape index: {}]   ;;  %s4882_s3 = inlined_call_operand.vmem [shape: f32[2,1,32], index: 3, kind: input, shape index: {}]   ;;  %s4883_s4 = inlined_call_operand.vmem [shape: f32[2,1,32], index: 4, kind: input, shape index: {}]   ;;  %s4884_s5 = inlined_call_operand.vmem [shape: f32[2,32,96], index: 5, kind: input, shape index: {}]   ;;  %s4885_s6 = inlined_call_operand.vmem [shape: f32[2,1,96], index: 6, kind: input, shape index: {}]   ;;  %s4886_s7 = inlined_call_operand.vmem [shape: f32[2,32,32], index: 7, kind: input, shape index: {}]   ;;  %s4887_s8 = inlined_call_operand.vmem [shape: f32[2,1,32], index: 8, kind: input, shape index: {}]   ;;  %s4888_s9 = inlined_call_operand.vmem [shape: f32[2,1,32], index: 9, kind: input, shape index: {}]   ;;  %s4889_s10 = inlined_call_operand.vmem [shape: f32[2,1,32], index: 10, kind: input, shape index: {}]   ;;  %s4890_s11 = inlined_call_operand.vmem [shape: f32[2,32,64], index: 11, kind: input, shape index: {}]   ;;  %s4891_s12 = inlined_call_operand.vmem [shape: f32[2,1,64], index: 12, kind: input, shape index: {}]   ;;  %s4892_s13 = inlined_call_operand.vmem [shape: f32[2,64,32], index: 13, kind: input, shape index: {}]   ;;  %s4893_s14 = inlined_call_operand.vmem [shape: f32[2,1,32], index: 14, kind: input, shape index: {}]   ;;  %s4894_s15 = inlined_call_operand.vmem [shape: f32[1,32], index: 15, kind: input, shape index: {}]   ;;  %s4895_s16 = inlined_call_operand.vmem [shape: f32[1,32], index: 16, kind: input, shape index: {}]   ;;  %s4896_s17 = inlined_call_operand.vmem [shape: f32[32,8], index: 17, kind: input, shape index: {}]   ;;  %s4897_s18 = inlined_call_operand.vmem [shape: f32[1,8], index: 18, kind: input, shape index: {}]   ;;  %s4898_s19 = inlined_call_operand.hbm [shape: f32[2,8], index: 19, kind: output, shape index: {}]  }
   0x1   :  { %4913 = sst [smem:[#allocation5_spill]] %s4879_s0 }
   0x2   :  { %4914 = sst [smem:[#allocation6_spill]] %s4880_s1 }
   0x3   :  { %4915 = sst [smem:[#allocation7_spill]] %s4881_s2 }
   0x4   :  { %4916 = sst [smem:[#allocation8_spill]] %s4882_s3 }
   0x5   :  { %s4917_s20 = sld [smem:[#allocation7_spill]] }
   0x6   :  { %s4918_s0 = sld [smem:[#allocation5_spill]] }
   0xb   :  { %v98_v0 = vld [vmem:[%s4917_s20 + $0xf8] sm:$0xff]  ;;  %v97_v2 = vld [vmem:[%s4917_s20 + $0xf0] sm:$0xff]  ;;  %v96_v4 = vld [vmem:[%s4917_s20 + $0xe8] sm:$0xff] }
   0xc   :  { %v82_v1 = vld [vmem:[%s4917_s20 + $0x78] sm:$0xff]  ;;  %3585 = vmatprep.subr.mxu0 %v98_v0  ;;  %v81_v3 = vld [vmem:[%s4917_s20 + $0x70] sm:$0xff]  ;;  %v80_v5 = vld [vmem:[%s4917_s20 + $0x68] sm:$0xff] }
   0xd   :  { %3586 = vmatpush3.msra.mxu0 %v82_v1  ;;  %v95_v6 = vld [vmem:[%s4917_s20 + $0xe0] sm:$0xff]  ;;  %v94_v8 = vld [vmem:[%s4917_s20 + $0xd8] sm:$0xff]  ;;  %v93_v10 = vld [vmem:[%s4917_s20 + $0xd0] sm:$0xff] }
   0xe   :  { %3587 = vmatprep.subr.mxu0 %v97_v2  ;;  %v79_v7 = vld [vmem:[%s4917_s20 + $0x60] sm:$0xff]  ;;  %v78_v9 = vld [vmem:[%s4917_s20 + $0x58] sm:$0xff]  ;;  %v77_v11 = vld [vmem:[%s4917_s20 + $0x50] sm:$0xff] }
   0xf   :  { %3588 = vmatpush3.msra.mxu0 %v81_v3  ;;  %v92_v12 = vld [vmem:[%s4917_s20 + $0xc8] sm:$0xff]  ;;  %v91_v15 = vld [vmem:[%s4917_s20 + $0xc0] sm:$0xff] }
  0x10   :  { %3589 = vmatprep.subr.mxu0 %v96_v4  ;;  %v64_v13 = vld [vmem:[%s4918_s0 + $0x8] sm:$0xff] }
  0x11   :  { %3590 = vmatpush3.msra.mxu0 %v80_v5  ;;  %v76_v14 = vld [vmem:[%s4917_s20 + $0x48] sm:$0xff]  ;;  %165 = vmatprep.mubr.f32.mxu0 %v64_v13 }
  0x12   :  { %3591 = vmatprep.subr.mxu0 %v95_v6 }
  0x13   :  { %3592 = vmatpush3.msra.mxu0 %v79_v7 }
  0x14   :  { %3593 = vmatprep.subr.mxu0 %v94_v8 }
  0x15   :  { %3594 = vmatpush3.msra.mxu0 %v78_v9 }
  0x16   :  { %3595 = vmatprep.subr.mxu0 %v93_v10 }
  0x17   :  { %3596 = vmatpush3.msra.mxu0 %v77_v11 }
  0x18   :  { %24 = vsyncpa [#allocation3], 0  ;;  %3597 = vmatprep.subr.mxu0 %v92_v12  ;;  %v75_v16 = vld [vmem:[%s4917_s20 + $0x40] sm:$0xff]  ;;  %v90_v17 = vld [vmem:[%s4917_s20 + $0xb8] sm:$0xff]  ;;  %s4919_s24 = sld [smem:[#allocation6_spill]]  ;;  %vm223_vm0 = vcmask 261120  }
  0x19   :  { %3598 = vmatpush3.msra.mxu0 %v76_v14  ;;  %v74_v18 = vld [vmem:[%s4917_s20 + $0x38] sm:$0xff]  ;;  %v89_v19 = vld [vmem:[%s4917_s20 + $0xb0] sm:$0xff]  ;;  %v88_v21 = vld [vmem:[%s4917_s20 + $0xa8] sm:$0xff]  ;;  %vm227_vm1 = vcmask 254976   ;;  %vm370_vm2 = vcmask 64512   ;;  %vm462_vm5 = vcmask 74752  }
  0x1a   :  { %3599 = vmatprep.subr.mxu0 %v91_v15  ;;  %v73_v20 = vld [vmem:[%s4917_s20 + $0x30] sm:$0xff]  ;;  %v72_v22 = vld [vmem:[%s4917_s20 + $0x28] sm:$0xff]  ;;  %v87_v23 = vld [vmem:[%s4917_s20 + $0xa0] sm:$0xff]  ;;  %vm458_vm6 = vcmask 80896   ;;  %s4134_s26 = smov 64   ;;  %s4135_s27 = smov 88  }
  0x1b   :  { %3600 = vmatpush3.msra.mxu0 %v75_v16  ;;  %v71_v24 = vld [vmem:[%s4917_s20 + $0x20] sm:$0xff]  ;;  %v86_v25 = vld [vmem:[%s4917_s20 + $0x98] sm:$0xff]  ;;  %v85_v27 = vld [vmem:[%s4917_s20 + $0x90] sm:$0xff]  ;;  %s4136_s28 = smov 120   ;;  %vm493_vm7 = vcmask 1041408   ;;  %s4137_s21 = smov 56  }
  0x1c   :  { %3601 = vmatprep.subr.mxu0 %v90_v17  ;;  %v70_v26 = vld [vmem:[%s4917_s20 + $0x18] sm:$0xff]  ;;  %v69_v28 = vld [vmem:[%s4917_s20 + $0x10] sm:$0xff]  ;;  %v84_v29 = vld [vmem:[%s4917_s20 + $0x88] sm:$0xff]  ;;  %s4138_s1 = smov 80   ;;  %s4911_s22 = smov 112   ;;  %vm1679_vm8 = vcmask 523264  }
  0x1d   :  { %3602 = vmatpush3.msra.mxu0 %v74_v18  ;;  %v68_v30 = vld [vmem:[%s4917_s20 + $0x8] sm:$0xff]  ;;  %v83_v31 = vld [vmem:[%s4917_s20 + $0x80] sm:$0xff]  ;;  %v66_v34 = vld [vmem:[%s4918_s0 + $0x18] sm:$0x3]  ;;  %s4909_s2 = smov 72   ;;  %s4907_s23 = smov 104  }
  0x1e   :  { %3603 = vmatprep.subr.mxu0 %v89_v19  ;;  %v67_v32 = vld [vmem:[%s4917_s20] sm:$0xff]  ;;  %v65_v35 = vld [vmem:[%s4918_s0 + $0x10] sm:$0x3]  ;;  %v100_v42 = vld [vmem:[%s4919_s24 + $0x8] sm:$0x3]  ;;  %s4920_s20 = sld [smem:[#allocation8_spill]] }
  0x1f   :  { %3604 = vmatpush3.msra.mxu0 %v73_v20  ;;  %v63_v33 = vld [vmem:[%s4918_s0] sm:$0xff]  ;;  %v271_v58 = vld [vmem:[%s4884_s5 + $0x18] sm:$0xff]  ;;  %v270_v59 = vld [vmem:[%s4884_s5 + $0x10] sm:$0xff]  ;;  %s4132_s0 = smov 96   ;;  %s4905_s3 = smov 48   ;;  %vm4145_vm9 = vmmov 0  }
  0x20   :  { %3605 = vmatprep.subr.mxu0 %v88_v21  ;;  %v99_v37 = vld [vmem:[%s4919_s24] sm:$0xff]  ;;  %3760 = vmatprep.subr.mxu1 %v271_v58  ;;  %v269_v60 = vld [vmem:[%s4884_s5 + $0x8] sm:$0xff]  ;;  %v176_v21 = vlaneseq  ;;  %s4903_s29 = smov 40   ;;  %s4146_s25 = smov [#allocation2]   ;;  %vm3437_vm10 = vcmask 58368  }
  0x21   :  { %3606 = vmatpush3.msra.mxu0 %v72_v22  ;;  %3761 = vmatpush3.msra.mxu1 %v271_v58  ;;  %v268_v61 = vld [vmem:[%s4884_s5] sm:$0xff] }
  0x22   :  { %3607 = vmatprep.subr.mxu0 %v87_v23  ;;  %3762 = vmatprep.subr.mxu1 %v270_v59  ;;  %v3454_v7 = vld [vmem:[%s4883_s4] ss:$0 sm:$0xff]  ;;  %v177_v22 = vshrl.u32 %v176_v21, 7 }
  0x23   :  { %3608 = vmatpush3.msra.mxu0 %v71_v24  ;;  %3763 = vmatpush3.msra.mxu1 %v270_v59  ;;  %v3455_v14 = vld [vmem:[%s4885_s6] ss:$0 sm:$0xff]  ;;  %v180_v24 = vand.u32 127, %v176_v21 }
  0x24   :  { %3609 = vmatprep.subr.mxu0 %v86_v25  ;;  %3764 = vmatprep.subr.mxu1 %v269_v60  ;;  %v3453_v5 = vld [vmem:[%s4920_s20] ss:$0 sm:$0xff]  ;;  %v178_v23 = vadd.s32 8, %v177_v22 }
  0x25   :  { %3610 = vmatpush3.msra.mxu0 %v70_v26  ;;  %3765 = vmatpush3.msra.mxu1 %v269_v60  ;;  %v209_v26 = vand.u32 1, %v180_v24 }
  0x26   :  { %3611 = vmatprep.subr.mxu0 %v85_v27  ;;  %3766 = vmatprep.subr.mxu1 %v268_v61  ;;  %v192_v25 = vand.u32 1, %v178_v23  ;;  %v185_v27 = vand.u32 1, %v177_v22 }
  0x27   :  { %3612 = vmatpush3.msra.mxu0 %v69_v28  ;;  %3767 = vmatpush3.msra.mxu1 %v268_v61 }
  0x28   :  { %3613 = vmatprep.subr.mxu0 %v84_v29  ;;  %vm218_vm3 = vcmp.eq.s32.totalorder %v192_v25, %v209_v26  ;;  %vm217_vm4 = vcmp.eq.s32.totalorder %v185_v27, %v209_v26  ;;  %v4133_v29 = vmov -1e+09   ;;  %v361_v26 = vld [vmem:[%s4886_s7 + $0x8] sm:$0xff] }
  0x29   :  { %3614 = vmatpush3.msra.mxu0 %v68_v30  ;;  %v4412_v30 = vsel %vm218_vm3, 0.0, %v4133_v29 }
  0x2a   :  { %3615 = vmatprep.subr.mxu0 %v83_v31 }
  0x2b   :  { %3616 = vmatpush3.msra.mxu0 %v67_v32 }
  0x2c   :  { %166 = vmatmul.mubr.f32.vlgmr.msra.gmra.mxu0 %v63_v33  ;;  %v4414_v33 = vsel %vm217_vm4, 0.0, %v4133_v29 }
  0x2d   :  { %170 = vmatprep.mubr.f32.mxu0 %v66_v34 }
  0x30   :  { %171 = vmatmul.mubr.f32.gmra.mxu0 %v65_v35 }
  0xec   :  { %v3617_v36 = vpop.f32.mrf.mxu0 }
  0xee   :  { %v3618_v38 = vpop.f32.mrf.mxu0 }
  0xef   :  { %v3619_v39 = vadd.f32 %v3618_v38, %v3617_v36 }
  0xf0   :  { %v3620_v40 = vpop.f32.mrf.mxu0 }
  0xf1   :  { %v4358_v41 = vadd.f32 %v3619_v39, %v99_v37 }
  0xf2   :  { %v3621_v43 = vpop.f32.mrf.mxu0 }
  0xf3   :  { %v3622_v44 = vadd.f32 %v3621_v43, %v3620_v40  ;;  %v224_v45 = vsel %vm223_vm0, %v4358_v41, 0.0 }
  0xf4   :  { %225 = vadd.xlane.f32.xlu0 %v224_v45 }
  0xf5   :  { %v4365_v46 = vadd.f32 %v3622_v44, %v100_v42 }
  0xf7   :  { %v228_v47 = vsel %vm227_vm1, %v4365_v46, 0.0 }
  0xf8   :  { %229 = vadd.xlane.f32.xlu0 %v228_v47 }
 0x17d   :  { %v226_v48 = vpop.xlane.xlu0 %225 }
 0x17e   :  { %v232_v49 = vmul.f32 0.03125, %v226_v48 }
 0x180   :  { %v234_v50 = vsub.f32 %v4358_v41, %v232_v49 }
 0x181   :  { %v230_v51 = vpop.xlane.xlu0 %229 }
 0x182   :  { %v233_v52 = vmul.f32 0.03125, %v230_v51  ;;  %v236_v53 = vmul.f32 %v234_v50, %v234_v50 }
 0x184   :  { %v235_v54 = vsub.f32 %v4365_v46, %v233_v52  ;;  %v238_v55 = vsel %vm223_vm0, %v236_v53, 0.0 }
 0x185   :  { %239 = vadd.xlane.f32.xlu1 %v238_v55 }
 0x186   :  { %v237_v56 = vmul.f32 %v235_v54, %v235_v54 }
 0x188   :  { %v241_v57 = vsel %vm227_vm1, %v237_v56, 0.0 }
 0x189   :  { %242 = vadd.xlane.f32.xlu1 %v241_v57 }
 0x20e   :  { %v240_v62 = vpop.xlane.xlu1 %239 }
 0x20f   :  { %v244_v63 = vmul.f32 0.03125, %v240_v62 }
 0x211   :  { %v246_v0 = vadd.f32 1e-06, %v244_v63  ;;  %v360_v63 = vld [vmem:[%s4886_s7] sm:$0xff] }
 0x212   :  { %v243_v1 = vpop.xlane.xlu1 %242  ;;  %3804 = vmatprep.subr.mxu0 %v360_v63 }
 0x213   :  { %4020 = vrsqrt.f32 %v246_v0  ;;  %v245_v2 = vmul.f32 0.03125, %v243_v1  ;;  %3805 = vmatpush3.msra.mxu0 %v360_v63 }
 0x215   :  { %v247_v3 = vadd.f32 1e-06, %v245_v2 }
 0x217   :  { %4022 = vrsqrt.f32 %v247_v3 }
 0x220   :  { %v4021_v4 = vpop.eup %4020 }
 0x221   :  { %v250_v6 = vmul.f32 %v4021_v4, %v234_v50 }
 0x223   :  { %v258_v8 = vmul.f32 %v3453_v5, %v250_v6 }
 0x224   :  { %v4023_v9 = vpop.eup %4022 }
 0x225   :  { %v251_v10 = vmul.f32 %v4023_v9, %v235_v54  ;;  %v266_v11 = vadd.f32 %v3454_v7, %v258_v8 }
 0x227   :  { %v259_v12 = vmul.f32 %v3453_v5, %v251_v10  ;;  %3768 = vmatprep.mubr.msk.f32.mxu1 %vm223_vm0, %v266_v11 }
 0x229   :  { %v267_v13 = vadd.f32 %v3454_v7, %v259_v12 }
 0x22b   :  { %3769 = vmatmul.mubr.msk.f32.vlgmr.msra.gmra.mxu1 %vm223_vm0, %v267_v13 }
 0x2eb   :  { %v3770_v15 = vpop.f32.mrf.mxu1 }
 0x2ec   :  { %v4396_v16 = vadd.f32 %v3770_v15, %v3455_v14 }
 0x2ed   :  { %v351_v17 = vpop.f32.mrf.mxu1 }
 0x2ee   :  { %v4398_v18 = vadd.f32 %v3455_v14, %v351_v17  ;;  %368 = vrot.lane.b32.xlu0 %v4396_v16, %s4132_s0 }
 0x2f0   :  { %366 = vrot.lane.b32.xlu1 %v4398_v18, %s4132_s0  ;;  %3775 = vmatprep.mubr.msk.f32.mxu1 %vm370_vm2, %v4398_v18 }
 0x360   :  { %v369_v19 = vpop.permute.xlu0 %368 }
 0x361   :  { %3771 = vmatprep.subr.msk.mxu1 %vm370_vm2, %v369_v19 }
 0x362   :  { %3772 = vmatpush3.xpose.msk.msra.mxu1 %vm370_vm2, %v369_v19  ;;  %v367_v20 = vpop.permute.xlu1 %366 }
 0x363   :  { %3773 = vmatprep.subr.msk.mxu1 %vm370_vm2, %v367_v20 }
 0x366   :  { %3774 = vmatpush3.xpose.msk.msra.mxu1 %vm370_vm2, %v367_v20 }
 0x369   :  { %3776 = vmatmul.mubr.msk.f32.vlgmr.msra.gmra.mxu1 %vm370_vm2, %v4396_v16 }
 0x429   :  { %v3777_v28 = vpop.f32.mrf.mxu1 }
 0x42a   :  { %v455_v31 = vmul.f32 0.35355338, %v3777_v28 }
 0x42b   :  { %v445_v32 = vpop.f32.mrf.mxu1 }
 0x42c   :  { %v454_v34 = vmul.f32 0.35355338, %v445_v32  ;;  %v457_v35 = vadd.f32 %v455_v31, %v4412_v30 }
 0x42e   :  { %v463_v36 = vsel %vm462_vm5, %v457_v35, -inf  ;;  %v456_v37 = vadd.f32 %v454_v34, %v4414_v33 }
 0x42f   :  { %464 = vmax.xlane.f32.xlu0 %v463_v36 }
 0x430   :  { %v459_v38 = vsel %vm458_vm6, %v456_v37, -inf }
 0x431   :  { %460 = vmax.xlane.f32.xlu1 %v459_v38 }
 0x4b8   :  { %v465_v39 = vpop.xlane.xlu0 %464 }
 0x4b9   :  { %v467_v40 = vsub.f32 %v457_v35, %v465_v39 }
 0x4ba   :  { %v461_v42 = vpop.xlane.xlu1 %460 }
 0x4bb   :  { %v470_v43 = vmul.f32 1.442695, %v467_v40  ;;  %v466_v44 = vsub.f32 %v456_v37, %v461_v42 }
 0x4bd   :  { %4024 = vpow2.f32 %v470_v43  ;;  %v468_v45 = vmul.f32 1.442695, %v466_v44 }
 0x4bf   :  { %4026 = vpow2.f32 %v468_v45 }
 0x4ca   :  { %v4025_v47 = vpop.eup %4024 }
 0x4cb   :  { %v475_v48 = vsel %vm462_vm5, %v4025_v47, 0.0 }
 0x4cc   :  { %v4027_v49 = vpop.eup %4026  ;;  %476 = vadd.xlane.f32.xlu1 %v475_v48 }
 0x4cd   :  { %v472_v50 = vsel %vm458_vm6, %v4027_v49, 0.0 }
 0x4ce   :  { %473 = vadd.xlane.f32.xlu0 %v472_v50 }
 0x4dd   :  { %482 = vrot.lane.b32.xlu1 %v4398_v18, %s4134_s26 }
 0x4e1   :  { %577 = vrot.lane.b32.xlu1 %v4396_v16, %s4135_s27 }
 0x4e4   :  { %484 = vrot.lane.b32.xlu0 %v4396_v16, %s4134_s26 }
 0x4e5   :  { %575 = vrot.lane.b32.xlu1 %v4398_v18, %s4135_s27 }
 0x4e8   :  { %571 = vrot.lane.b32.xlu0 %v4398_v18, %s4136_s28 }
 0x4e9   :  { %573 = vrot.lane.b32.xlu1 %v4396_v16, %s4136_s28 }
 0x555   :  { %v477_v51 = vpop.xlane.xlu1 %476 }
 0x556   :  { %4028 = vrcp.f32 %v477_v51 }
 0x557   :  { %v474_v52 = vpop.xlane.xlu0 %473 }
 0x558   :  { %4030 = vrcp.f32 %v474_v52 }
 0x559   :  { %v483_v53 = vpop.permute.xlu1 %482 }
 0x55b   :  { %v485_v54 = vpop.permute.xlu0 %484 }
 0x55c   :  { %3778 = vmatprep.subr.msk.mxu1 %vm493_vm7, %v485_v54 }
 0x55d   :  { %3779 = vmatpush3.msk.msra.mxu1 %vm493_vm7, %v485_v54  ;;  %v578_v55 = vpop.permute.xlu1 %577 }
 0x55e   :  { %3780 = vmatprep.subr.mxu1 %v483_v53 }
 0x55f   :  { %3781 = vmatpush3.msra.mxu1 %v483_v53  ;;  %v572_v60 = vpop.permute.xlu0 %571 }
 0x560   :  { %3785 = vmatprep.subr.msk.mxu1 %vm370_vm2, %v578_v55 }
 0x561   :  { %v576_v61 = vpop.permute.xlu1 %575 }
 0x563   :  { %v4029_v56 = vpop.eup %4028 }
 0x564   :  { %v481_v59 = vmul.f32 %v4029_v56, %v4025_v47 }
 0x565   :  { %v4031_v57 = vpop.eup %4030  ;;  %v574_v62 = vpop.permute.xlu1 %573 }
 0x566   :  { %v480_v58 = vmul.f32 %v4031_v57, %v4027_v49 }
 0x568   :  { %3782 = vmatprep.mubr.msk.f32.mxu1 %vm458_vm6, %v480_v58 }
 0x569   :  { %3783 = vmatmul.mubr.msk.f32.vlgmr.msra.gmra.mxu1 %vm458_vm6, %v481_v59 }
 0x56a   :  { %3786 = vmatpush3.xpose.msk.msra.mxu1 %vm370_vm2, %v578_v55  ;;  %3789 = vmatprep.mubr.msk.f32.mxu1 %vm370_vm2, %v572_v60 }
 0x56b   :  { %3787 = vmatprep.subr.msk.mxu1 %vm370_vm2, %v576_v61 }
 0x56e   :  { %3788 = vmatpush3.xpose.msk.msra.mxu1 %vm370_vm2, %v576_v61 }
 0x571   :  { %3790 = vmatmul.mubr.msk.f32.vlgmr.msra.gmra.mxu1 %vm370_vm2, %v574_v62 }
 0x629   :  { %v3784_v0 = vpop.f32.mrf.mxu1 }
 0x62b   :  { %v562_v1 = vpop.f32.mrf.mxu1 }
 0x62c   :  { %3806 = vmatprep.mubr.msk.f32.mxu0 %vm370_vm2, %v562_v1 }
 0x62d   :  { %3807 = vmatmul.mubr.msk.f32.vlgmr.msra.gmra.mxu0 %vm370_vm2, %v3784_v0 }
 0x631   :  { %v3791_v2 = vpop.f32.mrf.mxu1 }
 0x632   :  { %v663_v3 = vmul.f32 0.35355338, %v3791_v2 }
 0x633   :  { %v653_v4 = vpop.f32.mrf.mxu1 }
 0x634   :  { %v662_v5 = vmul.f32 0.35355338, %v653_v4  ;;  %v665_v6 = vadd.f32 %v663_v3, %v4412_v30 }
 0x636   :  { %v669_v7 = vsel %vm462_vm5, %v665_v6, -inf  ;;  %v664_v8 = vadd.f32 %v662_v5, %v4414_v33 }
 0x637   :  { %670 = vmax.xlane.f32.xlu1 %v669_v7 }
 0x638   :  { %v666_v9 = vsel %vm458_vm6, %v664_v8, -inf }
 0x639   :  { %667 = vmax.xlane.f32.xlu0 %v666_v9 }
 0x648   :  { %688 = vrot.lane.b32.xlu1 %v4398_v18, %s4137_s21 }
 0x64c   :  { %944 = vrot.lane.b32.xlu1 %v4396_v16, %s4138_s1 }
 0x650   :  { %942 = vrot.lane.b32.xlu1 %v4398_v18, %s4138_s1 }
 0x654   :  { %940 = vrot.lane.b32.xlu1 %v4396_v16, %s4911_s22 }
 0x658   :  { %1230 = vrot.lane.b32.xlu1 %v4398_v18, %s4909_s2 }
 0x65c   :  { %1228 = vrot.lane.b32.xlu1 %v4396_v16, %s4907_s23 }
 0x6c0   :  { %v671_v10 = vpop.xlane.xlu1 %670 }
 0x6c1   :  { %v673_v11 = vsub.f32 %v665_v6, %v671_v10 }
 0x6c2   :  { %v668_v12 = vpop.xlane.xlu0 %667 }
 0x6c3   :  { %v676_v13 = vmul.f32 1.442695, %v673_v11  ;;  %v672_v14 = vsub.f32 %v664_v8, %v668_v12 }
 0x6c4   :  { %v689_v25 = vpop.permute.xlu1 %688 }
 0x6c5   :  { %4032 = vpow2.f32 %v676_v13  ;;  %v674_v15 = vmul.f32 1.442695, %v672_v14 }
 0x6c7   :  { %4034 = vpow2.f32 %v674_v15 }
 0x6c8   :  { %v945_v32 = vpop.permute.xlu1 %944 }
 0x6cc   :  { %v943_v36 = vpop.permute.xlu1 %942 }
 0x6d0   :  { %v941_v39 = vpop.permute.xlu1 %940 }
 0x6d2   :  { %v4033_v17 = vpop.eup %4032 }
 0x6d3   :  { %v681_v19 = vsel %vm462_vm5, %v4033_v17, 0.0 }
 0x6d4   :  { %v4035_v20 = vpop.eup %4034  ;;  %682 = vadd.xlane.f32.xlu0 %v681_v19  ;;  %v1231_v42 = vpop.permute.xlu1 %1230 }
 0x6d5   :  { %v678_v21 = vsel %vm458_vm6, %v4035_v20, 0.0 }
 0x6d8   :  { %679 = vadd.xlane.f32.xlu0 %v678_v21  ;;  %v1229_v43 = vpop.permute.xlu1 %1228 }
 0x6ee   :  { %690 = vrot.lane.b32.xlu0 %v4396_v16, %s4137_s21 }
 0x6f2   :  { %938 = vrot.lane.b32.xlu0 %v4398_v18, %s4911_s22 }
 0x6f6   :  { %1232 = vrot.lane.b32.xlu0 %v4396_v16, %s4909_s2 }
 0x6fa   :  { %1226 = vrot.lane.b32.xlu0 %v4398_v18, %s4907_s23  ;;  %s3445_s23 = sshll.u32 %s4146_s25, 4  ;;  %s3446_s23 = int_to_ptr.vmem [resolvable:$true] %s3445_s23 }
 0x6fb   :  { %p4115_p1 = scmp.lt.s32.totalorder %s3446_s23, %s3446_s23 }
 0x75d   :  { %v683_v22 = vpop.xlane.xlu0 %682 }
 0x75e   :  { %4036 = vrcp.f32 %v683_v22 }
 0x761   :  { %v680_v23 = vpop.xlane.xlu0 %679 }
 0x762   :  { %4038 = vrcp.f32 %v680_v23 }
 0x765   :  { %v691_v24 = vpop.permute.xlu0 %690 }
 0x766   :  { %3792 = vmatprep.subr.msk.mxu1 %vm493_vm7, %v691_v24 }
 0x767   :  { %3793 = vmatpush3.msk.msra.mxu1 %vm493_vm7, %v691_v24 }
 0x768   :  { %3794 = vmatprep.subr.mxu1 %v689_v25 }
 0x769   :  { %3795 = vmatpush3.msra.mxu1 %v689_v25  ;;  %v939_v34 = vpop.permute.xlu0 %938 }
 0x76a   :  { %3799 = vmatprep.subr.mxu1 %v361_v26 }
 0x76b   :  { %v4037_v27 = vpop.eup %4036 }
 0x76c   :  { %v687_v31 = vmul.f32 %v4037_v27, %v4033_v17 }
 0x76d   :  { %v1233_v38 = vpop.permute.xlu0 %1232 }
 0x76f   :  { %v4039_v28 = vpop.eup %4038 }
 0x770   :  { %v686_v29 = vmul.f32 %v4039_v28, %v4035_v20  ;;  %v362_v20 = vld [vmem:[%s4886_s7 + $0x10] sm:$0xff] }
 0x771   :  { %v1227_v40 = vpop.permute.xlu0 %1226 }
 0x772   :  { %3796 = vmatprep.mubr.msk.f32.mxu1 %vm458_vm6, %v686_v29 }
 0x773   :  { %3797 = vmatmul.mubr.msk.f32.vlgmr.msra.gmra.mxu1 %vm458_vm6, %v687_v31 }
 0x774   :  { %3800 = vmatpush3.msra.mxu1 %v361_v26 }
 0x775   :  { %3809 = vmatprep.subr.msk.mxu1 %vm370_vm2, %v945_v32 }
 0x833   :  { %v3798_v35 = vpop.f32.mrf.mxu1 }
 0x835   :  { %v767_v37 = vpop.f32.mrf.mxu1 }
 0x836   :  { %3801 = vmatprep.mubr.msk.f32.mxu1 %vm370_vm2, %v767_v37 }
 0x837   :  { %3802 = vmatmul.mubr.msk.f32.vlgmr.msra.gmra.mxu1 %vm370_vm2, %v3798_v35 }
 0x838   :  { %3810 = vmatpush3.xpose.msk.msra.mxu1 %vm370_vm2, %v945_v32  ;;  %3813 = vmatprep.mubr.msk.f32.mxu1 %vm370_vm2, %v939_v34  ;;  %v3808_v32 = vpop.f32.mrf.mxu0 }
 0x839   :  { %3811 = vmatprep.subr.msk.mxu1 %vm370_vm2, %v943_v36 }
 0x83a   :  { %v929_v34 = vpop.f32.mrf.mxu0 }
 0x83c   :  { %3812 = vmatpush3.xpose.msk.msra.mxu1 %vm370_vm2, %v943_v36 }
 0x83d   :  { %3828 = vmatprep.subr.msk.mxu1 %vm370_vm2, %v1233_v38 }
 0x83f   :  { %3814 = vmatmul.mubr.msk.f32.vlgmr.msra.gmra.mxu1 %vm370_vm2, %v941_v39 }
 0x840   :  { %3829 = vmatpush3.xpose.msk.msra.mxu1 %vm370_vm2, %v1233_v38  ;;  %3832 = vmatprep.mubr.msk.f32.mxu1 %vm370_vm2, %v1227_v40 }
 0x841   :  { %3830 = vmatprep.subr.msk.mxu1 %vm370_vm2, %v1231_v42 }
 0x844   :  { %3831 = vmatpush3.xpose.msk.msra.mxu1 %vm370_vm2, %v1231_v42 }
 0x847   :  { %3833 = vmatmul.mubr.msk.f32.vlgmr.msra.gmra.mxu1 %vm370_vm2, %v1229_v43  ;;  %v363_v43 = vld [vmem:[%s4886_s7 + $0x18] sm:$0xff] }
 0x8f7   :  { %v4496_v44 = vpop.f32.mrf.mxu1 }
 0x8f9   :  { %v4498_v45 = vpop.f32.mrf.mxu1 }
 0x8ff   :  { %v3815_v47 = vpop.f32.mrf.mxu1 }
 0x900   :  { %v1030_v48 = vmul.f32 0.35355338, %v3815_v47  ;;  %v935_v47 = vadd.f32 %v3808_v32, %v4496_v44  ;;  %v1676_v32 = vld [vmem:[%s4892_s13 + $0x28] sm:$0xff] }
 0x901   :  { %v1020_v49 = vpop.f32.mrf.mxu1 }
 0x902   :  { %v1029_v50 = vmul.f32 0.35355338, %v1020_v49  ;;  %v1032_v51 = vadd.f32 %v1030_v48, %v4412_v30  ;;  %v930_v49 = vadd.f32 %v929_v34, %v4498_v45  ;;  %v1675_v34 = vld [vmem:[%s4892_s13 + $0x20] sm:$0xff] }
 0x904   :  { %v1036_v52 = vsel %vm462_vm5, %v1032_v51, -inf  ;;  %v1031_v53 = vadd.f32 %v1029_v50, %v4414_v33 }
 0x905   :  { %1037 = vmax.xlane.f32.xlu1 %v1036_v52 }
 0x906   :  { %v1033_v54 = vsel %vm458_vm6, %v1031_v53, -inf }
 0x907   :  { %1034 = vmax.xlane.f32.xlu0 %v1033_v54  ;;  %v3834_v55 = vpop.f32.mrf.mxu1 }
 0x908   :  { %v1318_v10 = vmul.f32 0.35355338, %v3834_v55 }
 0x909   :  { %v1308_v56 = vpop.f32.mrf.mxu1 }
 0x90a   :  { %v1317_v57 = vmul.f32 0.35355338, %v1308_v56  ;;  %v1320_v11 = vadd.f32 %v1318_v10, %v4412_v30  ;;  %v1570_v10 = vld [vmem:[%s4890_s11 + $0x8] sm:$0xff] }
 0x90c   :  { %v1319_v58 = vadd.f32 %v1317_v57, %v4414_v33  ;;  %v1324_v12 = vsel %vm462_vm5, %v1320_v11, -inf  ;;  %v3494_v57 = vld [vmem:[%s4887_s8] ss:$0 sm:$0xff] }
 0x90e   :  { %v1321_v59 = vsel %vm458_vm6, %v1319_v58, -inf }
 0x916   :  { %1055 = vrot.lane.b32.xlu1 %v4398_v18, %s4905_s3 }
 0x93a   :  { %1322 = vmax.xlane.f32.xlu1 %v1321_v59 }
 0x98e   :  { %v1038_v60 = vpop.xlane.xlu1 %1037 }
 0x98f   :  { %v1040_v61 = vsub.f32 %v1032_v51, %v1038_v60 }
 0x990   :  { %v1035_v62 = vpop.xlane.xlu0 %1034 }
 0x991   :  { %v1043_v63 = vmul.f32 1.442695, %v1040_v61  ;;  %v1039_v0 = vsub.f32 %v1031_v53, %v1035_v62 }
 0x992   :  { %v1056_v6 = vpop.permute.xlu1 %1055 }
 0x993   :  { %4040 = vpow2.f32 %v1043_v63  ;;  %v1041_v1 = vmul.f32 1.442695, %v1039_v0 }
 0x995   :  { %4042 = vpow2.f32 %v1041_v1 }
 0x9a0   :  { %v4041_v2 = vpop.eup %4040 }
 0x9a1   :  { %v1048_v3 = vsel %vm462_vm5, %v4041_v2, 0.0 }
 0x9a2   :  { %v4043_v4 = vpop.eup %4042  ;;  %1049 = vadd.xlane.f32.xlu0 %v1048_v3 }
 0x9a3   :  { %v1045_v5 = vsel %vm458_vm6, %v4043_v4, 0.0 }
 0x9a6   :  { %1046 = vadd.xlane.f32.xlu0 %v1045_v5 }
 0x9bc   :  { %1057 = vrot.lane.b32.xlu0 %v4396_v16, %s4905_s3 }
 0x9c3   :  { %v1323_v7 = vpop.xlane.xlu1 %1322 }
 0x9c4   :  { %v1327_v8 = vsub.f32 %v1319_v58, %v1323_v7 }
 0x9c6   :  { %v1329_v9 = vmul.f32 1.442695, %v1327_v8  ;;  %v1572_v8 = vld [vmem:[%s4890_s11 + $0x18] sm:$0xff] }
 0x9c7   :  { %3847 = vmatprep.subr.mxu1 %v1572_v8 }
 0x9c8   :  { %4044 = vpow2.f32 %v1329_v9  ;;  %v1571_v9 = vld [vmem:[%s4890_s11 + $0x10] sm:$0xff]  ;;  %3848 = vmatpush3.msra.mxu1 %v1572_v8  ;;  %v3510_v8 = vld [vmem:[%s4884_s5 + $0x38] sm:$0xff] }
 0x9c9   :  { %3849 = vmatprep.subr.mxu1 %v1571_v9 }
 0x9ca   :  { %3850 = vmatpush3.msra.mxu1 %v1571_v9  ;;  %v3509_v9 = vld [vmem:[%s4884_s5 + $0x30] sm:$0xff] }
 0x9cb   :  { %3851 = vmatprep.subr.mxu1 %v1570_v10 }
 0x9cc   :  { %3852 = vmatpush3.msra.mxu1 %v1570_v10  ;;  %v3508_v10 = vld [vmem:[%s4884_s5 + $0x28] sm:$0xff] }
 0x9d5   :  { %v4045_v13 = vpop.eup %4044 }
 0x9d6   :  { %v1333_v14 = vsel %vm458_vm6, %v4045_v13, 0.0 }
 0x9db   :  { %1325 = vmax.xlane.f32.xlu0 %v1324_v12 }
 0x9df   :  { %1334 = vadd.xlane.f32.xlu0 %v1333_v14 }
 0x9f5   :  { %1345 = vrot.lane.b32.xlu0 %v4396_v16, %s4903_s29 }
 0xa2b   :  { %v1050_v15 = vpop.xlane.xlu0 %1049 }
 0xa2c   :  { %4046 = vrcp.f32 %v1050_v15 }
 0xa2f   :  { %v1047_v17 = vpop.xlane.xlu0 %1046 }
 0xa30   :  { %4048 = vrcp.f32 %v1047_v17 }
 0xa33   :  { %v1058_v19 = vpop.permute.xlu0 %1057 }
 0xa34   :  { %3816 = vmatprep.subr.msk.mxu0 %vm493_vm7, %v1058_v19 }
 0xa35   :  { %3817 = vmatpush3.msk.msra.mxu0 %vm493_vm7, %v1058_v19 }
 0xa36   :  { %3818 = vmatprep.subr.mxu0 %v1056_v6 }
 0xa37   :  { %3819 = vmatpush3.msra.mxu0 %v1056_v6 }
 0xa38   :  { %3823 = vmatprep.subr.mxu0 %v362_v20 }
 0xa39   :  { %v4047_v21 = vpop.eup %4046 }
 0xa3a   :  { %v1054_v16 = vmul.f32 %v4047_v21, %v4041_v2  ;;  %v3495_v21 = vld [vmem:[%s4888_s9] ss:$0 sm:$0xff] }
 0xa3d   :  { %v4049_v22 = vpop.eup %4048 }
 0xa3e   :  { %v1053_v23 = vmul.f32 %v4049_v22, %v4043_v4 }
 0xa40   :  { %3820 = vmatprep.mubr.msk.f32.mxu0 %vm458_vm6, %v1053_v23 }
 0xa41   :  { %3821 = vmatmul.mubr.msk.f32.vlgmr.msra.gmra.mxu0 %vm458_vm6, %v1054_v16 }
 0xa42   :  { %3824 = vmatpush3.msra.mxu0 %v362_v20 }
 0xa64   :  { %v1326_v24 = vpop.xlane.xlu0 %1325 }
 0xa65   :  { %v1328_v25 = vsub.f32 %v1320_v11, %v1326_v24  ;;  %v1569_v11 = vld [vmem:[%s4890_s11] sm:$0xff] }
 0xa66   :  { %3853 = vmatprep.subr.mxu1 %v1569_v11 }
 0xa67   :  { %v1331_v26 = vmul.f32 1.442695, %v1328_v25  ;;  %3854 = vmatpush3.msra.mxu1 %v1569_v11  ;;  %v3496_v25 = vld [vmem:[%s4889_s10] ss:$0 sm:$0xff] }
 0xa68   :  { %v1335_v27 = vpop.xlane.xlu0 %1334  ;;  %3877 = vmatprep.subr.mxu1 %v3510_v8  ;;  %v3507_v11 = vld [vmem:[%s4884_s5 + $0x20] sm:$0xff] }
 0xa69   :  { %4050 = vpow2.f32 %v1331_v26 }
 0xa6a   :  { %4052 = vrcp.f32 %v1335_v27 }
 0xa6c   :  { %v1346_v28 = vpop.permute.xlu0 %1345 }
 0xa6d   :  { %3835 = vmatprep.subr.msk.mxu0 %vm493_vm7, %v1346_v28 }
 0xa76   :  { %v4051_v29 = vpop.eup %4050 }
 0xa77   :  { %v1336_v31 = vsel %vm462_vm5, %v4051_v29, 0.0  ;;  %v4053_v35 = vpop.eup %4052 }
 0xa78   :  { %1337 = vadd.xlane.f32.xlu1 %v1336_v31  ;;  %v1341_v39 = vmul.f32 %v4053_v35, %v4045_v13  ;;  %v1677_v31 = vld [vmem:[%s4892_s13 + $0x30] sm:$0xff]  ;;  %v1674_v35 = vld [vmem:[%s4892_s13 + $0x18] sm:$0xff] }
 0xa89   :  { %1343 = vrot.lane.b32.xlu1 %v4398_v18, %s4903_s29 }
 0xb01   :  { %v3822_v36 = vpop.f32.mrf.mxu0  ;;  %v1338_v37 = vpop.xlane.xlu1 %1337 }
 0xb02   :  { %4054 = vrcp.f32 %v1338_v37  ;;  %v1672_v37 = vld [vmem:[%s4892_s13 + $0x8] sm:$0xff] }
 0xb03   :  { %v1134_v38 = vpop.f32.mrf.mxu0 }
 0xb04   :  { %3825 = vmatprep.mubr.msk.f32.mxu0 %vm370_vm2, %v1134_v38  ;;  %v1671_v38 = vld [vmem:[%s4892_s13] sm:$0xff] }
 0xb05   :  { %3826 = vmatmul.mubr.msk.f32.vlgmr.msra.gmra.mxu0 %vm370_vm2, %v3822_v36  ;;  %v1344_v40 = vpop.permute.xlu1 %1343  ;;  %v1673_v36 = vld [vmem:[%s4892_s13 + $0x10] sm:$0xff] }
 0xb06   :  { %3836 = vmatpush3.msk.msra.mxu0 %vm493_vm7, %v1346_v28  ;;  %3839 = vmatprep.mubr.msk.f32.mxu0 %vm458_vm6, %v1341_v39  ;;  %v3497_v39 = vld [vmem:[%s4891_s12] ss:$0 sm:$0xff] }
 0xb07   :  { %3837 = vmatprep.subr.mxu0 %v1344_v40 }
 0xb08   :  { %3838 = vmatpush3.msra.mxu0 %v1344_v40 }
 0xb09   :  { %3842 = vmatprep.subr.mxu0 %v363_v43 }
 0xb0f   :  { %v4055_v18 = vpop.eup %4054 }
 0xb10   :  { %v1342_v42 = vmul.f32 %v4055_v18, %v4051_v29  ;;  %v1678_v29 = vld [vmem:[%s4892_s13 + $0x38] sm:$0xff] }
 0xb12   :  { %3840 = vmatmul.mubr.msk.f32.vlgmr.msra.gmra.mxu0 %vm458_vm6, %v1342_v42 }
 0xb13   :  { %3843 = vmatpush3.msra.mxu0 %v363_v43 }
 0xb14   :  { %3858 = vmatprep.subr.mxu0 %v1678_v29 }
 0xbc5   :  { %v3827_v48 = vpop.f32.mrf.mxu0 }
 0xbc6   :  { %v1225_v50 = vadd.f32 %v3827_v48, %v935_v47 }
 0xbc7   :  { %v1215_v51 = vpop.f32.mrf.mxu0 }
 0xbc8   :  { %v1224_v52 = vadd.f32 %v1215_v51, %v930_v49 }
 0xbd2   :  { %v3841_v53 = vpop.f32.mrf.mxu0 }
 0xbd4   :  { %v1422_v54 = vpop.f32.mrf.mxu0 }
 0xbd5   :  { %3844 = vmatprep.mubr.msk.f32.mxu0 %vm370_vm2, %v1422_v54 }
 0xbd6   :  { %3845 = vmatmul.mubr.msk.f32.vlgmr.msra.gmra.mxu0 %vm370_vm2, %v3841_v53 }
 0xbd7   :  { %3859 = vmatpush3.msra.mxu0 %v1678_v29  ;;  %v3512_v29 = vld [vmem:[%s4885_s6 + $0x1] ss:$0 sm:$0xff] }
 0xbd8   :  { %3860 = vmatprep.subr.mxu0 %v1677_v31 }
 0xbd9   :  { %3861 = vmatpush3.msra.mxu0 %v1677_v31 }
 0xbda   :  { %3862 = vmatprep.subr.mxu0 %v1676_v32 }
 0xbdb   :  { %3863 = vmatpush3.msra.mxu0 %v1676_v32 }
 0xbdc   :  { %3864 = vmatprep.subr.mxu0 %v1675_v34 }
 0xbdd   :  { %3865 = vmatpush3.msra.mxu0 %v1675_v34 }
 0xbde   :  { %3866 = vmatprep.subr.mxu0 %v1674_v35 }
 0xbdf   :  { %3867 = vmatpush3.msra.mxu0 %v1674_v35 }
 0xbe0   :  { %3868 = vmatprep.subr.mxu0 %v1673_v36 }
 0xbe1   :  { %3869 = vmatpush3.msra.mxu0 %v1673_v36 }
 0xbe2   :  { %3870 = vmatprep.subr.mxu0 %v1672_v37 }
 0xbe3   :  { %3871 = vmatpush3.msra.mxu0 %v1672_v37 }
 0xbe4   :  { %3872 = vmatprep.subr.mxu0 %v1671_v38 }
 0xbe5   :  { %3873 = vmatpush3.msra.mxu0 %v1671_v38 }
 0xc96   :  { %v3846_v55 = vpop.f32.mrf.mxu0 }
 0xc97   :  { %v1513_v56 = vadd.f32 %v3846_v55, %v1225_v50 }
 0xc98   :  { %v1503_v58 = vpop.f32.mrf.mxu0 }
 0xc99   :  { %v1515_v44 = vadd.f32 %v1513_v56, %v4365_v46  ;;  %v1512_v59 = vadd.f32 %v1503_v58, %v1224_v52  ;;  %v3502_v58 = vld [vmem:[%s4893_s14] ss:$0 sm:$0xff] }
 0xc9b   :  { %v4544_v45 = vadd.f32 %v3494_v57, %v1515_v44  ;;  %v1514_v60 = vadd.f32 %v1512_v59, %v4358_v41 }
 0xc9d   :  { %v4547_v61 = vadd.f32 %v3494_v57, %v1514_v60  ;;  %v1530_v62 = vsel %vm227_vm1, %v4544_v45, 0.0 }
 0xc9e   :  { %1531 = vadd.xlane.f32.xlu0 %v1530_v62 }
 0xc9f   :  { %v1527_v63 = vsel %vm223_vm0, %v4547_v61, 0.0 }
 0xca0   :  { %1528 = vadd.xlane.f32.xlu1 %v1527_v63 }
 0xd27   :  { %v1532_v0 = vpop.xlane.xlu0 %1531 }
 0xd28   :  { %v1534_v1 = vmul.f32 0.03125, %v1532_v0 }
 0xd29   :  { %v1529_v2 = vpop.xlane.xlu1 %1528 }
 0xd2a   :  { %v1536_v46 = vsub.f32 %v4544_v45, %v1534_v1  ;;  %v1533_v3 = vmul.f32 0.03125, %v1529_v2 }
 0xd2c   :  { %v1535_v4 = vsub.f32 %v4547_v61, %v1533_v3  ;;  %v1538_v5 = vmul.f32 %v1536_v46, %v1536_v46 }
 0xd2e   :  { %v1542_v41 = vsel %vm227_vm1, %v1538_v5, 0.0  ;;  %v1537_v6 = vmul.f32 %v1535_v4, %v1535_v4 }
 0xd2f   :  { %1543 = vadd.xlane.f32.xlu1 %v1542_v41 }
 0xd30   :  { %v1539_v7 = vsel %vm223_vm0, %v1537_v6, 0.0 }
 0xd31   :  { %1540 = vadd.xlane.f32.xlu0 %v1539_v7 }
 0xdb8   :  { %v1544_v12 = vpop.xlane.xlu1 %1543 }
 0xdb9   :  { %v1546_v13 = vmul.f32 0.03125, %v1544_v12 }
 0xdba   :  { %v1541_v14 = vpop.xlane.xlu0 %1540 }
 0xdbb   :  { %v1548_v15 = vadd.f32 1e-06, %v1546_v13  ;;  %v1545_v17 = vmul.f32 0.03125, %v1541_v14 }
 0xdbd   :  { %4056 = vrsqrt.f32 %v1548_v15  ;;  %v1547_v19 = vadd.f32 1e-06, %v1545_v17 }
 0xdbf   :  { %4058 = vrsqrt.f32 %v1547_v19 }
 0xdca   :  { %v4057_v20 = vpop.eup %4056 }
 0xdcb   :  { %v1552_v22 = vmul.f32 %v4057_v20, %v1536_v46 }
 0xdcc   :  { %v4059_v23 = vpop.eup %4058 }
 0xdcd   :  { %v1551_v16 = vmul.f32 %v4059_v23, %v1535_v4  ;;  %v1560_v24 = vmul.f32 %v3495_v21, %v1552_v22 }
 0xdcf   :  { %v1559_v26 = vmul.f32 %v3495_v21, %v1551_v16  ;;  %v1568_v28 = vadd.f32 %v3496_v25, %v1560_v24  ;;  %v3505_v21 = vld [vmem:[%s4920_s20 + $0x1] ss:$0 sm:$0xff]  ;;  %s4921_s20 = smov 112  }
 0xdd1   :  { %v1567_v27 = vadd.f32 %v3496_v25, %v1559_v26  ;;  %v3506_v25 = vld [vmem:[%s4883_s4 + $0x1] ss:$0 sm:$0xff] }
 0xdd3   :  { %3855 = vmatprep.mubr.msk.f32.mxu1 %vm223_vm0, %v1567_v27 }
 0xdd4   :  { %3856 = vmatmul.mubr.msk.f32.vlgmr.msra.gmra.mxu1 %vm223_vm0, %v1568_v28 }
 0xdd5   :  { %3878 = vmatpush3.msra.mxu1 %v3510_v8 }
 0xdd6   :  { %3879 = vmatprep.subr.mxu1 %v3509_v9 }
 0xdd7   :  { %3880 = vmatpush3.msra.mxu1 %v3509_v9 }
 0xdd8   :  { %3881 = vmatprep.subr.mxu1 %v3508_v10 }
 0xdd9   :  { %3882 = vmatpush3.msra.mxu1 %v3508_v10 }
 0xdda   :  { %3883 = vmatprep.subr.mxu1 %v3507_v11 }
 0xddb   :  { %3884 = vmatpush3.msra.mxu1 %v3507_v11 }
 0xe94   :  { %v3857_v40 = vpop.f32.mrf.mxu1 }
 0xe95   :  { %v1658_v18 = vadd.f32 %v3857_v40, %v3497_v39 }
 0xe96   :  { %v1652_v42 = vpop.f32.mrf.mxu1 }
 0xe97   :  { %v1664_v43 = vmul.f32 0.70710677, %v1658_v18  ;;  %v1653_v47 = vadd.f32 %v3497_v39, %v1652_v42  ;;  %v1662_v54 = vmul.f32 0.5, %v1658_v18 }
 0xe99   :  { %4060 = verf.f32 %v1664_v43  ;;  %v1663_v48 = vmul.f32 0.70710677, %v1653_v47  ;;  %v1661_v52 = vmul.f32 0.5, %v1653_v47 }
 0xe9b   :  { %4062 = verf.f32 %v1663_v48 }
 0xea6   :  { %v4061_v49 = vpop.eup %4060 }
 0xea7   :  { %v1668_v51 = vadd.f32 1.0, %v4061_v49 }
 0xea8   :  { %v4063_v50 = vpop.eup %4062 }
 0xea9   :  { %v1667_v53 = vadd.f32 1.0, %v4063_v50  ;;  %v1670_v56 = vmul.f32 %v1668_v51, %v1662_v54 }
 0xeab   :  { %v1669_v55 = vmul.f32 %v1667_v53, %v1661_v52 }
 0xead   :  { %3874 = vmatprep.mubr.msk.f32.mxu0 %vm1679_vm8, %v1669_v55 }
 0xeae   :  { %3875 = vmatmul.mubr.msk.f32.vlgmr.msra.gmra.mxu0 %vm1679_vm8, %v1670_v56 }
 0xf6e   :  { %v3876_v57 = vpop.f32.mrf.mxu0 }
 0xf6f   :  { %v1762_v44 = vadd.f32 %v3876_v57, %v4544_v45 }
 0xf70   :  { %v1752_v59 = vpop.f32.mrf.mxu0 }
 0xf71   :  { %v4610_v60 = vadd.f32 %v3502_v58, %v1762_v44  ;;  %v1761_v62 = vadd.f32 %v1752_v59, %v4547_v61 }
 0xf73   :  { %v4613_v63 = vadd.f32 %v3502_v58, %v1761_v62  ;;  %v1779_v0 = vsel %vm227_vm1, %v4610_v60, 0.0 }
 0xf74   :  { %1780 = vadd.xlane.f32.xlu1 %v1779_v0 }
 0xf75   :  { %v1776_v1 = vsel %vm223_vm0, %v4613_v63, 0.0 }
 0xf76   :  { %1777 = vadd.xlane.f32.xlu0 %v1776_v1 }
 0xffd   :  { %v1781_v2 = vpop.xlane.xlu1 %1780 }
 0xffe   :  { %v1783_v46 = vmul.f32 0.03125, %v1781_v2 }
 0xfff   :  { %v1778_v3 = vpop.xlane.xlu0 %1777 }
0x1000   :  { %v1785_v45 = vsub.f32 %v4610_v60, %v1783_v46  ;;  %v1782_v4 = vmul.f32 0.03125, %v1778_v3 }
0x1002   :  { %v1784_v5 = vsub.f32 %v4613_v63, %v1782_v4  ;;  %v1787_v41 = vmul.f32 %v1785_v45, %v1785_v45 }
0x1004   :  { %v1791_v61 = vsel %vm227_vm1, %v1787_v41, 0.0  ;;  %v1786_v6 = vmul.f32 %v1784_v5, %v1784_v5 }
0x1005   :  { %1792 = vadd.xlane.f32.xlu1 %v1791_v61  ;;  %v3515_v61 = vld [vmem:[%s4886_s7 + $0x20] sm:$0xff] }
0x1006   :  { %v1788_v7 = vsel %vm223_vm0, %v1786_v6, 0.0 }
0x1007   :  { %1789 = vadd.xlane.f32.xlu0 %v1788_v7 }
0x108e   :  { %v1793_v12 = vpop.xlane.xlu1 %1792 }
0x108f   :  { %v1795_v13 = vmul.f32 0.03125, %v1793_v12 }
0x1090   :  { %v1790_v14 = vpop.xlane.xlu0 %1789 }
0x1091   :  { %v1797_v15 = vadd.f32 1e-06, %v1795_v13  ;;  %v1794_v17 = vmul.f32 0.03125, %v1790_v14 }
0x1093   :  { %4064 = vrsqrt.f32 %v1797_v15  ;;  %v1796_v19 = vadd.f32 1e-06, %v1794_v17 }
0x1095   :  { %4066 = vrsqrt.f32 %v1796_v19 }
0x10a0   :  { %v4065_v20 = vpop.eup %4064 }
0x10a1   :  { %v1801_v22 = vmul.f32 %v4065_v20, %v1785_v45 }
0x10a2   :  { %v4067_v23 = vpop.eup %4066 }
0x10a3   :  { %v1800_v16 = vmul.f32 %v4067_v23, %v1784_v5  ;;  %v1809_v24 = vmul.f32 %v3505_v21, %v1801_v22 }
0x10a5   :  { %v1808_v26 = vmul.f32 %v3505_v21, %v1800_v16  ;;  %v1817_v28 = vadd.f32 %v3506_v25, %v1809_v24 }
0x10a7   :  { %v1816_v27 = vadd.f32 %v3506_v25, %v1808_v26 }
0x10a9   :  { %3885 = vmatprep.mubr.msk.f32.mxu1 %vm223_vm0, %v1816_v27 }
0x10aa   :  { %3886 = vmatmul.mubr.msk.f32.vlgmr.msra.gmra.mxu1 %vm223_vm0, %v1817_v28 }
0x116a   :  { %v3887_v31 = vpop.f32.mrf.mxu1 }
0x116b   :  { %v4646_v32 = vadd.f32 %v3887_v31, %v3512_v29 }
0x116c   :  { %v1903_v34 = vpop.f32.mrf.mxu1 }
0x116d   :  { %v4648_v35 = vadd.f32 %v3512_v29, %v1903_v34  ;;  %1921 = vrot.lane.b32.xlu0 %v4646_v32, %s4132_s0  ;;  %v3516_v34 = vld [vmem:[%s4886_s7 + $0x28] sm:$0xff] }
0x116f   :  { %1919 = vrot.lane.b32.xlu1 %v4648_v35, %s4132_s0  ;;  %3892 = vmatprep.mubr.msk.f32.mxu1 %vm370_vm2, %v4648_v35  ;;  %s4922_s0 = smov 72  }
0x11df   :  { %v1922_v36 = vpop.permute.xlu0 %1921 }
0x11e0   :  { %3888 = vmatprep.subr.msk.mxu1 %vm370_vm2, %v1922_v36 }
0x11e1   :  { %3889 = vmatpush3.xpose.msk.msra.mxu1 %vm370_vm2, %v1922_v36  ;;  %v1920_v37 = vpop.permute.xlu1 %1919 }
0x11e2   :  { %3890 = vmatprep.subr.msk.mxu1 %vm370_vm2, %v1920_v37 }
0x11e5   :  { %3891 = vmatpush3.xpose.msk.msra.mxu1 %vm370_vm2, %v1920_v37 }
0x11e8   :  { %3893 = vmatmul.mubr.msk.f32.vlgmr.msra.gmra.mxu1 %vm370_vm2, %v4646_v32 }
0x12a8   :  { %v3894_v38 = vpop.f32.mrf.mxu1 }
0x12a9   :  { %v2007_v39 = vmul.f32 0.35355338, %v3894_v38 }
0x12aa   :  { %v1997_v40 = vpop.f32.mrf.mxu1 }
0x12ab   :  { %v2006_v18 = vmul.f32 0.35355338, %v1997_v40  ;;  %v2009_v42 = vadd.f32 %v2007_v39, %v4412_v30 }
0x12ad   :  { %v2013_v43 = vsel %vm462_vm5, %v2009_v42, -inf  ;;  %v2008_v47 = vadd.f32 %v2006_v18, %v4414_v33 }
0x12ae   :  { %2014 = vmax.xlane.f32.xlu0 %v2013_v43 }
0x12af   :  { %v2010_v48 = vsel %vm458_vm6, %v2008_v47, -inf }
0x12b0   :  { %2011 = vmax.xlane.f32.xlu1 %v2010_v48 }
0x1337   :  { %v2015_v49 = vpop.xlane.xlu0 %2014 }
0x1338   :  { %v2017_v50 = vsub.f32 %v2009_v42, %v2015_v49 }
0x1339   :  { %v2012_v51 = vpop.xlane.xlu1 %2011 }
0x133a   :  { %v2020_v52 = vmul.f32 1.442695, %v2017_v50  ;;  %v2016_v53 = vsub.f32 %v2008_v47, %v2012_v51 }
0x133c   :  { %4068 = vpow2.f32 %v2020_v52  ;;  %v2018_v54 = vmul.f32 1.442695, %v2016_v53 }
0x133e   :  { %4070 = vpow2.f32 %v2018_v54 }
0x1349   :  { %v4069_v55 = vpop.eup %4068 }
0x134a   :  { %v2025_v56 = vsel %vm462_vm5, %v4069_v55, 0.0 }
0x134b   :  { %v4071_v57 = vpop.eup %4070  ;;  %2026 = vadd.xlane.f32.xlu1 %v2025_v56 }
0x134c   :  { %v2022_v58 = vsel %vm458_vm6, %v4071_v57, 0.0 }
0x134d   :  { %2023 = vadd.xlane.f32.xlu0 %v2022_v58 }
0x135c   :  { %2032 = vrot.lane.b32.xlu1 %v4648_v35, %s4134_s26 }
0x1360   :  { %2126 = vrot.lane.b32.xlu1 %v4646_v32, %s4135_s27 }
0x1363   :  { %2034 = vrot.lane.b32.xlu0 %v4646_v32, %s4134_s26  ;;  %s4923_s26 = smov 104  }
0x1364   :  { %2124 = vrot.lane.b32.xlu1 %v4648_v35, %s4135_s27 }
0x1367   :  { %2120 = vrot.lane.b32.xlu0 %v4648_v35, %s4136_s28 }
0x1368   :  { %2122 = vrot.lane.b32.xlu1 %v4646_v32, %s4136_s28 }
0x13d4   :  { %v2027_v44 = vpop.xlane.xlu1 %2026 }
0x13d5   :  { %4072 = vrcp.f32 %v2027_v44 }
0x13d6   :  { %v2024_v59 = vpop.xlane.xlu0 %2023 }
0x13d7   :  { %4074 = vrcp.f32 %v2024_v59 }
0x13d8   :  { %v2033_v62 = vpop.permute.xlu1 %2032 }
0x13da   :  { %v2035_v0 = vpop.permute.xlu0 %2034 }
0x13db   :  { %3895 = vmatprep.subr.msk.mxu0 %vm493_vm7, %v2035_v0 }
0x13dc   :  { %3896 = vmatpush3.msk.msra.mxu0 %vm493_vm7, %v2035_v0  ;;  %v2127_v1 = vpop.permute.xlu1 %2126 }
0x13dd   :  { %3897 = vmatprep.subr.mxu0 %v2033_v62 }
0x13de   :  { %3898 = vmatpush3.msra.mxu0 %v2033_v62  ;;  %v2121_v4 = vpop.permute.xlu0 %2120 }
0x13df   :  { %3902 = vmatprep.subr.msk.mxu0 %vm370_vm2, %v2127_v1 }
0x13e0   :  { %v2125_v5 = vpop.permute.xlu1 %2124 }
0x13e2   :  { %v4073_v2 = vpop.eup %4072 }
0x13e3   :  { %v2031_v45 = vmul.f32 %v4073_v2, %v4069_v55 }
0x13e4   :  { %v4075_v46 = vpop.eup %4074  ;;  %v2123_v41 = vpop.permute.xlu1 %2122 }
0x13e5   :  { %v2030_v3 = vmul.f32 %v4075_v46, %v4071_v57 }
0x13e7   :  { %3899 = vmatprep.mubr.msk.f32.mxu0 %vm458_vm6, %v2030_v3 }
0x13e8   :  { %3900 = vmatmul.mubr.msk.f32.vlgmr.msra.gmra.mxu0 %vm458_vm6, %v2031_v45 }
0x13e9   :  { %3903 = vmatpush3.xpose.msk.msra.mxu0 %vm370_vm2, %v2127_v1  ;;  %3906 = vmatprep.mubr.msk.f32.mxu0 %vm370_vm2, %v2121_v4 }
0x13ea   :  { %3904 = vmatprep.subr.msk.mxu0 %vm370_vm2, %v2125_v5 }
0x13ed   :  { %3905 = vmatpush3.xpose.msk.msra.mxu0 %vm370_vm2, %v2125_v5 }
0x13ee   :  { %3921 = vmatprep.subr.mxu0 %v3515_v61 }
0x13f0   :  { %3907 = vmatmul.mubr.msk.f32.vlgmr.msra.gmra.mxu0 %vm370_vm2, %v2123_v41 }
0x13f1   :  { %3922 = vmatpush3.msra.mxu0 %v3515_v61 }
0x14a8   :  { %v3901_v6 = vpop.f32.mrf.mxu0 }
0x14aa   :  { %v2111_v7 = vpop.f32.mrf.mxu0 }
0x14ab   :  { %3923 = vmatprep.mubr.msk.f32.mxu0 %vm370_vm2, %v2111_v7 }
0x14ac   :  { %3924 = vmatmul.mubr.msk.f32.vlgmr.msra.gmra.mxu0 %vm370_vm2, %v3901_v6 }
0x14b0   :  { %v3908_v8 = vpop.f32.mrf.mxu0 }
0x14b1   :  { %v2212_v9 = vmul.f32 0.35355338, %v3908_v8 }
0x14b2   :  { %v2202_v10 = vpop.f32.mrf.mxu0 }
0x14b3   :  { %v2211_v11 = vmul.f32 0.35355338, %v2202_v10  ;;  %v2214_v12 = vadd.f32 %v2212_v9, %v4412_v30 }
0x14b5   :  { %v2218_v13 = vsel %vm462_vm5, %v2214_v12, -inf  ;;  %v2213_v14 = vadd.f32 %v2211_v11, %v4414_v33 }
0x14b6   :  { %2219 = vmax.xlane.f32.xlu1 %v2218_v13 }
0x14b7   :  { %v2215_v15 = vsel %vm458_vm6, %v2213_v14, -inf }
0x14b8   :  { %2216 = vmax.xlane.f32.xlu0 %v2215_v15 }
0x14c7   :  { %2237 = vrot.lane.b32.xlu1 %v4648_v35, %s4137_s21 }
0x14cb   :  { %2493 = vrot.lane.b32.xlu1 %v4646_v32, %s4138_s1 }
0x14cf   :  { %2491 = vrot.lane.b32.xlu1 %v4648_v35, %s4138_s1  ;;  %s4925_s1 = smov 40  }
0x14d3   :  { %2489 = vrot.lane.b32.xlu1 %v4646_v32, %s4921_s20 }
0x14d7   :  { %2779 = vrot.lane.b32.xlu1 %v4648_v35, %s4922_s0 }
0x14db   :  { %2777 = vrot.lane.b32.xlu1 %v4646_v32, %s4923_s26 }
0x153f   :  { %v2220_v17 = vpop.xlane.xlu1 %2219 }
0x1540   :  { %v2222_v19 = vsub.f32 %v2214_v12, %v2220_v17 }
0x1541   :  { %v2217_v20 = vpop.xlane.xlu0 %2216 }
0x1542   :  { %v2225_v21 = vmul.f32 1.442695, %v2222_v19  ;;  %v2221_v22 = vsub.f32 %v2213_v14, %v2217_v20 }
0x1543   :  { %v2238_v31 = vpop.permute.xlu1 %2237 }
0x1544   :  { %4076 = vpow2.f32 %v2225_v21  ;;  %v2223_v23 = vmul.f32 1.442695, %v2221_v22 }
0x1546   :  { %4078 = vpow2.f32 %v2223_v23 }
0x1547   :  { %v2494_v40 = vpop.permute.xlu1 %2493 }
0x154b   :  { %v2492_v43 = vpop.permute.xlu1 %2491 }
0x154f   :  { %v2490_v49 = vpop.permute.xlu1 %2489 }
0x1551   :  { %v4077_v16 = vpop.eup %4076 }
0x1552   :  { %v2230_v24 = vsel %vm462_vm5, %v4077_v16, 0.0 }
0x1553   :  { %v4079_v25 = vpop.eup %4078  ;;  %2231 = vadd.xlane.f32.xlu0 %v2230_v24  ;;  %v2780_v51 = vpop.permute.xlu1 %2779 }
0x1554   :  { %v2227_v26 = vsel %vm458_vm6, %v4079_v25, 0.0 }
0x1557   :  { %2228 = vadd.xlane.f32.xlu0 %v2227_v26  ;;  %v2778_v52 = vpop.permute.xlu1 %2777 }
0x156d   :  { %2239 = vrot.lane.b32.xlu0 %v4646_v32, %s4137_s21  ;;  %s4924_s21 = smov 48  }
0x1571   :  { %2487 = vrot.lane.b32.xlu0 %v4648_v35, %s4921_s20 }
0x1575   :  { %2781 = vrot.lane.b32.xlu0 %v4646_v32, %s4922_s0 }
0x1579   :  { %2775 = vrot.lane.b32.xlu0 %v4648_v35, %s4923_s26 }
0x15dc   :  { %v2232_v27 = vpop.xlane.xlu0 %2231 }
0x15dd   :  { %4080 = vrcp.f32 %v2232_v27 }
0x15e0   :  { %v2229_v28 = vpop.xlane.xlu0 %2228 }
0x15e1   :  { %4082 = vrcp.f32 %v2229_v28 }
0x15e4   :  { %v2240_v29 = vpop.permute.xlu0 %2239 }
0x15e5   :  { %3909 = vmatprep.subr.msk.mxu1 %vm493_vm7, %v2240_v29 }
0x15e6   :  { %3910 = vmatpush3.msk.msra.mxu1 %vm493_vm7, %v2240_v29 }
0x15e7   :  { %3911 = vmatprep.subr.mxu1 %v2238_v31 }
0x15e8   :  { %3912 = vmatpush3.msra.mxu1 %v2238_v31  ;;  %v2488_v18 = vpop.permute.xlu0 %2487 }
0x15e9   :  { %3916 = vmatprep.subr.mxu1 %v3516_v34 }
0x15ea   :  { %v4081_v36 = vpop.eup %4080 }
0x15eb   :  { %v2236_v39 = vmul.f32 %v4081_v36, %v4077_v16 }
0x15ec   :  { %v2782_v48 = vpop.permute.xlu0 %2781 }
0x15ee   :  { %v4083_v37 = vpop.eup %4082 }
0x15ef   :  { %v2235_v38 = vmul.f32 %v4083_v37, %v4079_v25 }
0x15f0   :  { %v2776_v50 = vpop.permute.xlu0 %2775 }
0x15f1   :  { %3913 = vmatprep.mubr.msk.f32.mxu1 %vm458_vm6, %v2235_v38  ;;  %v3925_v38 = vpop.f32.mrf.mxu0 }
0x15f2   :  { %3914 = vmatmul.mubr.msk.f32.vlgmr.msra.gmra.mxu1 %vm458_vm6, %v2236_v39 }
0x15f3   :  { %3917 = vmatpush3.msra.mxu1 %v3516_v34  ;;  %v2478_v39 = vpop.f32.mrf.mxu0 }
0x15f4   :  { %3926 = vmatprep.subr.msk.mxu1 %vm370_vm2, %v2494_v40 }
0x16b2   :  { %v3915_v42 = vpop.f32.mrf.mxu1 }
0x16b4   :  { %v2316_v47 = vpop.f32.mrf.mxu1 }
0x16b5   :  { %3918 = vmatprep.mubr.msk.f32.mxu1 %vm370_vm2, %v2316_v47 }
0x16b6   :  { %3919 = vmatmul.mubr.msk.f32.vlgmr.msra.gmra.mxu1 %vm370_vm2, %v3915_v42 }
0x16b7   :  { %3927 = vmatpush3.xpose.msk.msra.mxu1 %vm370_vm2, %v2494_v40  ;;  %3930 = vmatprep.mubr.msk.f32.mxu1 %vm370_vm2, %v2488_v18 }
0x16b8   :  { %3928 = vmatprep.subr.msk.mxu1 %vm370_vm2, %v2492_v43 }
0x16bb   :  { %3929 = vmatpush3.xpose.msk.msra.mxu1 %vm370_vm2, %v2492_v43 }
0x16bc   :  { %3945 = vmatprep.subr.msk.mxu1 %vm370_vm2, %v2782_v48 }
0x16be   :  { %3931 = vmatmul.mubr.msk.f32.vlgmr.msra.gmra.mxu1 %vm370_vm2, %v2490_v49 }
0x16bf   :  { %3946 = vmatpush3.xpose.msk.msra.mxu1 %vm370_vm2, %v2782_v48  ;;  %3949 = vmatprep.mubr.msk.f32.mxu1 %vm370_vm2, %v2776_v50  ;;  %v3518_v50 = vld [vmem:[%s4886_s7 + $0x38] sm:$0xff] }
0x16c0   :  { %3947 = vmatprep.subr.msk.mxu1 %vm370_vm2, %v2780_v51 }
0x16c3   :  { %3948 = vmatpush3.xpose.msk.msra.mxu1 %vm370_vm2, %v2780_v51 }
0x16c6   :  { %3950 = vmatmul.mubr.msk.f32.vlgmr.msra.gmra.mxu1 %vm370_vm2, %v2778_v52 }
0x1776   :  { %v4742_v53 = vpop.f32.mrf.mxu1 }
0x1777   :  { %v2484_v51 = vadd.f32 %v3925_v38, %v4742_v53  ;;  %v3572_v38 = vld [vmem:[%s4892_s13 + $0x58] sm:$0xff] }
0x1778   :  { %v4744_v54 = vpop.f32.mrf.mxu1 }
0x177e   :  { %v3932_v55 = vpop.f32.mrf.mxu1 }
0x177f   :  { %v2579_v56 = vmul.f32 0.35355338, %v3932_v55  ;;  %v2479_v55 = vadd.f32 %v2478_v39, %v4744_v54  ;;  %v3571_v39 = vld [vmem:[%s4892_s13 + $0x50] sm:$0xff] }
0x1780   :  { %v2569_v57 = vpop.f32.mrf.mxu1 }
0x1781   :  { %v2578_v58 = vmul.f32 0.35355338, %v2569_v57  ;;  %v2581_v44 = vadd.f32 %v2579_v56, %v4412_v30 }
0x1783   :  { %v2585_v59 = vsel %vm462_vm5, %v2581_v44, -inf  ;;  %v2580_v62 = vadd.f32 %v2578_v58, %v4414_v33 }
0x1784   :  { %2586 = vmax.xlane.f32.xlu1 %v2585_v59 }
0x1785   :  { %v2582_v0 = vsel %vm458_vm6, %v2580_v62, -inf }
0x1786   :  { %2583 = vmax.xlane.f32.xlu0 %v2582_v0  ;;  %v3951_v1 = vpop.f32.mrf.mxu1 }
0x1787   :  { %v2867_v15 = vmul.f32 0.35355338, %v3951_v1 }
0x1788   :  { %v2857_v2 = vpop.f32.mrf.mxu1 }
0x1789   :  { %v2866_v46 = vmul.f32 0.35355338, %v2857_v2  ;;  %v2869_v17 = vadd.f32 %v2867_v15, %v4412_v30  ;;  %v3517_v30 = vld [vmem:[%s4886_s7 + $0x30] sm:$0xff]  ;;  %v3556_v2 = vld [vmem:[%s4887_s8 + $0x1] ss:$0 sm:$0xff] }
0x178b   :  { %v2868_v3 = vadd.f32 %v2866_v46, %v4414_v33  ;;  %v2873_v19 = vsel %vm462_vm5, %v2869_v17, -inf }
0x178d   :  { %v2870_v45 = vsel %vm458_vm6, %v2868_v3, -inf }
0x1795   :  { %2604 = vrot.lane.b32.xlu1 %v4648_v35, %s4924_s21 }
0x17b9   :  { %2871 = vmax.xlane.f32.xlu1 %v2870_v45 }
0x180d   :  { %v2587_v4 = vpop.xlane.xlu1 %2586 }
0x180e   :  { %v2589_v5 = vsub.f32 %v2581_v44, %v2587_v4 }
0x180f   :  { %v2584_v41 = vpop.xlane.xlu0 %2583 }
0x1810   :  { %v2592_v61 = vmul.f32 1.442695, %v2589_v5  ;;  %v2588_v6 = vsub.f32 %v2580_v62, %v2584_v41 }
0x1811   :  { %v2605_v33 = vpop.permute.xlu1 %2604 }
0x1812   :  { %4084 = vpow2.f32 %v2592_v61  ;;  %v2590_v7 = vmul.f32 1.442695, %v2588_v6 }
0x1814   :  { %4086 = vpow2.f32 %v2590_v7 }
0x181f   :  { %v4085_v8 = vpop.eup %4084 }
0x1820   :  { %v2597_v9 = vsel %vm462_vm5, %v4085_v8, 0.0 }
0x1821   :  { %v4087_v10 = vpop.eup %4086  ;;  %2598 = vadd.xlane.f32.xlu0 %v2597_v9 }
0x1822   :  { %v2594_v11 = vsel %vm458_vm6, %v4087_v10, 0.0 }
0x1825   :  { %2595 = vadd.xlane.f32.xlu0 %v2594_v11 }
0x183b   :  { %2606 = vrot.lane.b32.xlu0 %v4646_v32, %s4924_s21 }
0x1842   :  { %v2872_v12 = vpop.xlane.xlu1 %2871 }
0x1843   :  { %v2876_v13 = vsub.f32 %v2868_v3, %v2872_v12  ;;  %v3563_v12 = vld [vmem:[%s4890_s11 + $0x30] sm:$0xff] }
0x1845   :  { %v2878_v14 = vmul.f32 1.442695, %v2876_v13  ;;  %v3562_v13 = vld [vmem:[%s4890_s11 + $0x28] sm:$0xff] }
0x1847   :  { %4088 = vpow2.f32 %v2878_v14  ;;  %v3561_v14 = vld [vmem:[%s4890_s11 + $0x20] sm:$0xff] }
0x1854   :  { %v4089_v20 = vpop.eup %4088 }
0x1855   :  { %v2882_v21 = vsel %vm458_vm6, %v4089_v20, 0.0 }
0x185a   :  { %2874 = vmax.xlane.f32.xlu0 %v2873_v19 }
0x185e   :  { %2883 = vadd.xlane.f32.xlu0 %v2882_v21 }
0x1874   :  { %2894 = vrot.lane.b32.xlu0 %v4646_v32, %s4925_s1 }
0x18aa   :  { %v2599_v22 = vpop.xlane.xlu0 %2598 }
0x18ab   :  { %4090 = vrcp.f32 %v2599_v22 }
0x18ae   :  { %v2596_v23 = vpop.xlane.xlu0 %2595 }
0x18af   :  { %4092 = vrcp.f32 %v2596_v23 }
0x18b2   :  { %v2607_v16 = vpop.permute.xlu0 %2606 }
0x18b3   :  { %3933 = vmatprep.subr.msk.mxu0 %vm493_vm7, %v2607_v16 }
0x18b4   :  { %3934 = vmatpush3.msk.msra.mxu0 %vm493_vm7, %v2607_v16  ;;  %v3559_v16 = vld [vmem:[%s4888_s9 + $0x1] ss:$0 sm:$0xff] }
0x18b5   :  { %3935 = vmatprep.subr.mxu0 %v2605_v33 }
0x18b6   :  { %3936 = vmatpush3.msra.mxu0 %v2605_v33  ;;  %v3564_v33 = vld [vmem:[%s4890_s11 + $0x38] sm:$0xff] }
0x18b7   :  { %3940 = vmatprep.subr.mxu0 %v3517_v30  ;;  %3964 = vmatprep.subr.mxu1 %v3564_v33 }
0x18b8   :  { %v4091_v24 = vpop.eup %4090  ;;  %3965 = vmatpush3.msra.mxu1 %v3564_v33 }
0x18b9   :  { %v2603_v32 = vmul.f32 %v4091_v24, %v4085_v8  ;;  %3966 = vmatprep.subr.mxu1 %v3563_v12 }
0x18ba   :  { %3967 = vmatpush3.msra.mxu1 %v3563_v12  ;;  %v3582_v12 = vld [vmem:[%s4895_s16] ss:$0 sm:$0xff] }
0x18bb   :  { %3968 = vmatprep.subr.mxu1 %v3562_v13 }
0x18bc   :  { %v4093_v25 = vpop.eup %4092  ;;  %3969 = vmatpush3.msra.mxu1 %v3562_v13 }
0x18bd   :  { %v2602_v26 = vmul.f32 %v4093_v25, %v4087_v10  ;;  %3970 = vmatprep.subr.mxu1 %v3561_v14 }
0x18be   :  { %3971 = vmatpush3.msra.mxu1 %v3561_v14 }
0x18bf   :  { %3937 = vmatprep.mubr.msk.f32.mxu0 %vm458_vm6, %v2602_v26 }
0x18c0   :  { %3938 = vmatmul.mubr.msk.f32.vlgmr.msra.gmra.mxu0 %vm458_vm6, %v2603_v32  ;;  %v3560_v32 = vld [vmem:[%s4889_s10 + $0x1] ss:$0 sm:$0xff] }
0x18c1   :  { %3941 = vmatpush3.msra.mxu0 %v3517_v30 }
0x18e3   :  { %v2875_v27 = vpop.xlane.xlu0 %2874 }
0x18e4   :  { %v2877_v28 = vsub.f32 %v2869_v17, %v2875_v27 }
0x18e6   :  { %v2880_v29 = vmul.f32 1.442695, %v2877_v28 }
0x18e7   :  { %v2884_v31 = vpop.xlane.xlu0 %2883 }
0x18e8   :  { %4094 = vpow2.f32 %v2880_v29 }
0x18e9   :  { %4096 = vrcp.f32 %v2884_v31  ;;  %v3576_v31 = vld [vmem:[%s4892_s13 + $0x78] sm:$0xff] }
0x18eb   :  { %v2895_v34 = vpop.permute.xlu0 %2894 }
0x18ec   :  { %3952 = vmatprep.subr.msk.mxu0 %vm493_vm7, %v2895_v34 }
0x18f5   :  { %v4095_v36 = vpop.eup %4094 }
0x18f6   :  { %v2885_v37 = vsel %vm462_vm5, %v4095_v36, 0.0  ;;  %v4097_v40 = vpop.eup %4096 }
0x18f7   :  { %2886 = vadd.xlane.f32.xlu1 %v2885_v37  ;;  %v2890_v47 = vmul.f32 %v4097_v40, %v4089_v20  ;;  %v3573_v37 = vld [vmem:[%s4892_s13 + $0x60] sm:$0xff]  ;;  %v3570_v40 = vld [vmem:[%s4892_s13 + $0x48] sm:$0xff] }
0x1908   :  { %2892 = vrot.lane.b32.xlu1 %v4648_v35, %s4925_s1 }
0x1980   :  { %v3939_v18 = vpop.f32.mrf.mxu0  ;;  %v2887_v42 = vpop.xlane.xlu1 %2886 }
0x1981   :  { %4098 = vrcp.f32 %v2887_v42  ;;  %v3566_v42 = vld [vmem:[%s4891_s12 + $0x1] ss:$0 sm:$0xff] }
0x1982   :  { %v2683_v43 = vpop.f32.mrf.mxu0 }
0x1983   :  { %3942 = vmatprep.mubr.msk.f32.mxu0 %vm370_vm2, %v2683_v43 }
0x1984   :  { %3943 = vmatmul.mubr.msk.f32.vlgmr.msra.gmra.mxu0 %vm370_vm2, %v3939_v18  ;;  %v2893_v48 = vpop.permute.xlu1 %2892  ;;  %v3569_v18 = vld [vmem:[%s4892_s13 + $0x40] sm:$0xff] }
0x1985   :  { %3953 = vmatpush3.msk.msra.mxu0 %vm493_vm7, %v2895_v34  ;;  %3956 = vmatprep.mubr.msk.f32.mxu0 %vm458_vm6, %v2890_v47  ;;  %v3575_v34 = vld [vmem:[%s4892_s13 + $0x70] sm:$0xff] }
0x1986   :  { %3954 = vmatprep.subr.mxu0 %v2893_v48 }
0x1987   :  { %3955 = vmatpush3.msra.mxu0 %v2893_v48 }
0x1988   :  { %3959 = vmatprep.subr.mxu0 %v3518_v50 }
0x198e   :  { %v4099_v35 = vpop.eup %4098 }
0x198f   :  { %v2891_v49 = vmul.f32 %v4099_v35, %v4095_v36  ;;  %v3574_v36 = vld [vmem:[%s4892_s13 + $0x68] sm:$0xff] }
0x1991   :  { %3957 = vmatmul.mubr.msk.f32.vlgmr.msra.gmra.mxu0 %vm458_vm6, %v2891_v49 }
0x1992   :  { %3960 = vmatpush3.msra.mxu0 %v3518_v50 }
0x1993   :  { %3975 = vmatprep.subr.mxu0 %v3576_v31 }
0x1a44   :  { %v3944_v52 = vpop.f32.mrf.mxu0 }
0x1a45   :  { %v2774_v56 = vadd.f32 %v3944_v52, %v2484_v51 }
0x1a46   :  { %v2764_v57 = vpop.f32.mrf.mxu0 }
0x1a47   :  { %v2773_v58 = vadd.f32 %v2764_v57, %v2479_v55 }
0x1a51   :  { %v3958_v44 = vpop.f32.mrf.mxu0 }
0x1a53   :  { %v2971_v59 = vpop.f32.mrf.mxu0 }
0x1a54   :  { %3961 = vmatprep.mubr.msk.f32.mxu0 %vm370_vm2, %v2971_v59 }
0x1a55   :  { %3962 = vmatmul.mubr.msk.f32.vlgmr.msra.gmra.mxu0 %vm370_vm2, %v3958_v44 }
0x1a56   :  { %3976 = vmatpush3.msra.mxu0 %v3576_v31 }
0x1a57   :  { %3977 = vmatprep.subr.mxu0 %v3575_v34 }
0x1a58   :  { %3978 = vmatpush3.msra.mxu0 %v3575_v34 }
0x1a59   :  { %3979 = vmatprep.subr.mxu0 %v3574_v36 }
0x1a5a   :  { %3980 = vmatpush3.msra.mxu0 %v3574_v36 }
0x1a5b   :  { %3981 = vmatprep.subr.mxu0 %v3573_v37 }
0x1a5c   :  { %3982 = vmatpush3.msra.mxu0 %v3573_v37 }
0x1a5d   :  { %3983 = vmatprep.subr.mxu0 %v3572_v38 }
0x1a5e   :  { %3984 = vmatpush3.msra.mxu0 %v3572_v38 }
0x1a5f   :  { %3985 = vmatprep.subr.mxu0 %v3571_v39 }
0x1a60   :  { %3986 = vmatpush3.msra.mxu0 %v3571_v39 }
0x1a61   :  { %3987 = vmatprep.subr.mxu0 %v3570_v40 }
0x1a62   :  { %3988 = vmatpush3.msra.mxu0 %v3570_v40 }
0x1a63   :  { %3989 = vmatprep.subr.mxu0 %v3569_v18 }
0x1a64   :  { %3990 = vmatpush3.msra.mxu0 %v3569_v18 }
0x1b15   :  { %v3963_v62 = vpop.f32.mrf.mxu0 }
0x1b16   :  { %v3062_v0 = vadd.f32 %v3963_v62, %v2774_v56 }
0x1b17   :  { %v3052_v1 = vpop.f32.mrf.mxu0 }
0x1b18   :  { %v3064_v53 = vadd.f32 %v3062_v0, %v4610_v60  ;;  %v3061_v46 = vadd.f32 %v3052_v1, %v2773_v58  ;;  %v3580_v1 = vld [vmem:[%s4893_s14 + $0x1] ss:$0 sm:$0xff] }
0x1b1a   :  { %v3063_v54 = vadd.f32 %v3061_v46, %v4613_v63  ;;  %v3074_v3 = vadd.f32 %v3556_v2, %v3064_v53 }
0x1b1c   :  { %v3082_v45 = vsel %vm227_vm1, %v3074_v3, 0.0  ;;  %v4792_v4 = vadd.f32 %v3556_v2, %v3063_v54 }
0x1b1d   :  { %3083 = vadd.xlane.f32.xlu0 %v3082_v45 }
0x1b1e   :  { %v3079_v5 = vsel %vm223_vm0, %v4792_v4, 0.0 }
0x1b1f   :  { %3080 = vadd.xlane.f32.xlu1 %v3079_v5 }
0x1ba6   :  { %v3084_v41 = vpop.xlane.xlu0 %3083 }
0x1ba7   :  { %v3086_v61 = vmul.f32 0.03125, %v3084_v41 }
0x1ba8   :  { %v3081_v6 = vpop.xlane.xlu1 %3080 }
0x1ba9   :  { %v3088_v7 = vsub.f32 %v3074_v3, %v3086_v61  ;;  %v3085_v8 = vmul.f32 0.03125, %v3081_v6  ;;  %v4144_v61 = vmov 0.0   ;;  %v3356_v6 = vld [vmem:[%s4896_s17 + $0x18] sm:$0xff] }
0x1baa   :  { %3994 = vmatprep.subr.mxu1 %v4144_v61 }
0x1bab   :  { %v3087_v60 = vsub.f32 %v4792_v4, %v3085_v8  ;;  %v3090_v9 = vmul.f32 %v3088_v7, %v3088_v7  ;;  %v3353_v8 = vld [vmem:[%s4896_s17] sm:$0xff] }
0x1bad   :  { %v3094_v63 = vsel %vm227_vm1, %v3090_v9, 0.0  ;;  %v3089_v10 = vmul.f32 %v3087_v60, %v3087_v60 }
0x1bae   :  { %3095 = vadd.xlane.f32.xlu1 %v3094_v63 }
0x1baf   :  { %v3091_v11 = vsel %vm223_vm0, %v3089_v10, 0.0 }
0x1bb0   :  { %3092 = vadd.xlane.f32.xlu0 %v3091_v11  ;;  %v3581_v11 = vld [vmem:[%s4894_s15] ss:$0 sm:$0xff]  ;;  %s4110_s15 = scalar_lea.vmem %s3446_s23, 32 }
0x1bb1   :  { %p4111_p0 = scmp.ne.s32.totalorder %s3446_s23, %s4110_s15  ;;  %p4116_p2 = scmp.lt.s32.totalorder %s4110_s15, %s4110_s15 }
0x1bb3   :  { %p4117_p3 = por %p4116_p2, %p4115_p1 }
0x1bb5   :  { %p4118_p4 = pnand %p4117_p3, %p4111_p0 }
0x1c37   :  { %v3096_v15 = vpop.xlane.xlu1 %3095 }
0x1c38   :  { %v3098_v17 = vmul.f32 0.03125, %v3096_v15  ;;  %v3583_v15 = vld [vmem:[%s4897_s18] ss:$0 sm:$0xff] }
0x1c39   :  { %v3093_v19 = vpop.xlane.xlu0 %3092 }
0x1c3a   :  { %v3100_v20 = vadd.f32 1e-06, %v3098_v17  ;;  %v3097_v21 = vmul.f32 0.03125, %v3093_v19 }
0x1c3c   :  { %4100 = vrsqrt.f32 %v3100_v20  ;;  %v3099_v22 = vadd.f32 1e-06, %v3097_v21 }
0x1c3e   :  { %4102 = vrsqrt.f32 %v3099_v22 }
0x1c49   :  { %v4101_v23 = vpop.eup %4100 }
0x1c4a   :  { %v3104_v30 = vmul.f32 %v4101_v23, %v3088_v7  ;;  %v3354_v7 = vld [vmem:[%s4896_s17 + $0x8] sm:$0xff] }
0x1c4b   :  { %v4103_v24 = vpop.eup %4102 }
0x1c4c   :  { %v3103_v25 = vmul.f32 %v4103_v24, %v3087_v60  ;;  %v3112_v26 = vmul.f32 %v3559_v16, %v3104_v30 }
0x1c4e   :  { %v3111_v27 = vmul.f32 %v3559_v16, %v3103_v25  ;;  %v3120_v29 = vadd.f32 %v3560_v32, %v3112_v26 }
0x1c50   :  { %v3119_v28 = vadd.f32 %v3560_v32, %v3111_v27 }
0x1c52   :  { %3972 = vmatprep.mubr.msk.f32.mxu1 %vm223_vm0, %v3119_v28 }
0x1c53   :  { %3973 = vmatmul.mubr.msk.f32.vlgmr.msra.gmra.mxu1 %vm223_vm0, %v3120_v29 }
0x1c54   :  { %3995 = vmatpush3.msra.mxu1 %v3356_v6  ;;  %4002 = vmatprep.mubr.msk.f32.mxu1 %vm4145_vm9, %v4144_v61 }
0x1c55   :  { %3996 = vmatprep.subr.mxu1 %v4144_v61 }
0x1d13   :  { %v3974_v43 = vpop.f32.mrf.mxu1 }
0x1d14   :  { %v3212_v47 = vadd.f32 %v3974_v43, %v3566_v42 }
0x1d15   :  { %v3206_v48 = vpop.f32.mrf.mxu1 }
0x1d16   :  { %v3218_v35 = vmul.f32 0.70710677, %v3212_v47  ;;  %v3207_v49 = vadd.f32 %v3566_v42, %v3206_v48  ;;  %v3216_v58 = vmul.f32 0.5, %v3212_v47 }
0x1d18   :  { %4104 = verf.f32 %v3218_v35  ;;  %v3217_v50 = vmul.f32 0.70710677, %v3207_v49  ;;  %v3215_v56 = vmul.f32 0.5, %v3207_v49 }
0x1d1a   :  { %4106 = verf.f32 %v3217_v50 }
0x1d25   :  { %v4105_v51 = vpop.eup %4104 }
0x1d26   :  { %v3222_v55 = vadd.f32 1.0, %v4105_v51 }
0x1d27   :  { %v4107_v52 = vpop.eup %4106 }
0x1d28   :  { %v3221_v57 = vadd.f32 1.0, %v4107_v52  ;;  %v3224_v59 = vmul.f32 %v3222_v55, %v3216_v58 }
0x1d2a   :  { %v3223_v44 = vmul.f32 %v3221_v57, %v3215_v56 }
0x1d2c   :  { %3991 = vmatprep.mubr.msk.f32.mxu0 %vm1679_vm8, %v3223_v44 }
0x1d2d   :  { %3992 = vmatmul.mubr.msk.f32.vlgmr.msra.gmra.mxu0 %vm1679_vm8, %v3224_v59 }
0x1ded   :  { %v3993_v62 = vpop.f32.mrf.mxu0 }
0x1def   :  { %v3306_v0 = vpop.f32.mrf.mxu0 }
0x1df0   :  { %v3314_v2 = vadd.f32 %v3306_v0, %v4792_v4  ;;  %v3355_v4 = vld [vmem:[%s4896_s17 + $0x10] sm:$0xff] }
0x1df1   :  { %3997 = vmatpush3.msra.mxu1 %v3355_v4 }
0x1df2   :  { %v3323_v53 = vadd.f32 %v3580_v1, %v3314_v2  ;;  %3998 = vmatprep.subr.mxu1 %v4144_v61 }
0x1df3   :  { %3999 = vmatpush3.msra.mxu1 %v3354_v7 }
0x1df4   :  { %v3326_v46 = vsel %vm227_vm1, %v3323_v53, 0.0  ;;  %4000 = vmatprep.subr.mxu1 %v4144_v61 }
0x1df5   :  { %3327 = vadd.xlane.f32.xlu0 %v3326_v46  ;;  %4001 = vmatpush3.msra.mxu1 %v3353_v8 }
0x1e7e   :  { %v3328_v54 = vpop.xlane.xlu0 %3327 }
0x1e7f   :  { %v3329_v3 = vmul.f32 0.03125, %v3328_v54 }
0x1e81   :  { %v3330_v45 = vsub.f32 %v3323_v53, %v3329_v3 }
0x1e83   :  { %v3331_v5 = vmul.f32 %v3330_v45, %v3330_v45 }
0x1e85   :  { %v3332_v41 = vsel %vm227_vm1, %v3331_v5, 0.0 }
0x1e86   :  { %3333 = vadd.xlane.f32.xlu1 %v3332_v41 }
0x1f0f   :  { %v3334_v60 = vpop.xlane.xlu1 %3333 }
0x1f10   :  { %v3335_v9 = vmul.f32 0.03125, %v3334_v60 }
0x1f12   :  { %v3336_v63 = vadd.f32 1e-06, %v3335_v9 }
0x1f14   :  { %4108 = vrsqrt.f32 %v3336_v63 }
0x1f21   :  { %v4109_v10 = vpop.eup %4108 }
0x1f22   :  { %v3338_v33 = vmul.f32 %v4109_v10, %v3330_v45 }
0x1f24   :  { %v3345_v13 = vmul.f32 %v3581_v11, %v3338_v33 }
0x1f26   :  { %v3352_v14 = vadd.f32 %v3582_v12, %v3345_v13 }
0x1f28   :  { %4003 = vmatmul.mubr.msk.f32.vlgmr.msra.gmra.mxu1 %vm223_vm0, %v3352_v14 }
0x1fe8   :  { %v3433_v17 = vpop.f32.mrf.mxu1 }
0x1fe9   :  { %v3434_v19 = vadd.f32 %v3583_v15, %v3433_v17 }
0x1fea   :  { %v4004_v20 = vpop.f32.mrf.mxu1 }
0x1feb   :  { %3438 = vst.msk [vmem:[#allocation2] sm:$0x3] %vm3437_vm10, %v3434_v19 }
0x1fec   :  { %4121 = shalt.err (!%p4118_p4)
}
0x1fed   :  { %3448 = dma.vmem_to_hbm [thread:$0]  %s3446_s23, 32, %s4898_s19, [#allocation3]  }
0x1fee   :  { %4130 = dma.done.wait [#allocation3], 32  }
0x1fef   :  { %4131 = vsyncadd [#allocation3], 4294967264 }
0x1ff0   :  { %3452 = vsyncpa [#allocation3], 1 }

</bundles_post_ra>
